<compile_context>
chip_gen: v6e
topology: v6e:2x2x1
jax: 0.10.0
libtpu: 0.0.40
codegen_flags: <defaults>
</compile_context>

<pallas_src>
import functools

import jax
import jax.numpy as jnp
from jax.experimental import pallas as pl
from jax.experimental.pallas import tpu as pltpu

GN_EPS = 1e-5
HM_CLAMP = 1e-4
NORM_EPS = 1e-12   # F.normalize eps


# --------------------------------------------------------------------------- helpers
def _pick_strip_rows(h, target):
    """Largest divisor of h that is <= target (strip height in image rows)."""
    best = 1
    for d in range(1, min(h, target) + 1):
        if h % d == 0:
            best = d
    return best


def _conv_strip(xs_ref, w3_ref, *, sh, wp, cin, ch2):
    """3x3 conv (pad=1) for one H-strip: 9 accumulating bf16 MXU matmuls.

    xs_ref: [(sh+3)*Wp, Cin] f32  zero-padded feature strip incl. 3-row halo
    w3_ref: [9*Cin, 2Ch]     f32  conv weights, tap-major (ky*3 + kx)
    Returns [sh*Wp, 2Ch] f32.  Positions with x >= W inside each Wp-row are
    "junk" (they mix wrapped columns) and are masked by the callers.
    """
    shwp = sh * wp
    acc = jnp.zeros((shwp, ch2), jnp.float32)
    for dy in range(3):
        for dx in range(3):
            t = dy * 3 + dx
            off = dy * wp + dx                                   # static offset
            slab = xs_ref[off:off + shwp, :].astype(jnp.bfloat16)
            wt = w3_ref[t * cin:(t + 1) * cin, :].astype(jnp.bfloat16)
            acc = acc + jnp.dot(slab, wt, preferred_element_type=jnp.float32)
    return acc


# --------------------------------------------------------------------------- kernels
def _stats_kernel(xs_ref, w3_ref, b3_ref, mask_ref, stats_ref,
                  *, sh, wp, cin, ch2):
    """Pass 1: accumulate per-channel sum / sum-of-squares of the conv output."""
    s = pl.program_id(1)

    @pl.when(s == 0)
    def _():
        stats_ref[...] = jnp.zeros_like(stats_ref)

    acc = _conv_strip(xs_ref, w3_ref, sh=sh, wp=wp, cin=cin, ch2=ch2)
    acc = acc + b3_ref[...]
    m = mask_ref[...]                                            # [1, sh*Wp]
    # Masked sums via two M=1 matmuls (mask excludes the junk columns).
    s1 = jnp.dot(m, acc, preferred_element_type=jnp.float32)     # [1, 2Ch]
    s2 = jnp.dot(m, acc * acc, preferred_element_type=jnp.float32)
    stats_ref[0:1, :] = stats_ref[0:1, :] + s1
    stats_ref[1:2, :] = stats_ref[1:2, :] + s2


def _head_kernel(xs_ref, w3_ref, b3_ref, scale_ref, shift_ref, w1t_ref,
                 b1t_ref, mask_ref, o_ref, *, sh, wp, cin, ch2, n_cls):
    """Pass 2: conv + GroupNorm(apply) + ReLU + 1x1 + per-channel epilogue."""
    acc = _conv_strip(xs_ref, w3_ref, sh=sh, wp=wp, cin=cin, ch2=ch2)
    acc = acc + b3_ref[...]

    # GroupNorm with precomputed global per-channel scale/shift, then ReLU.
    y = acc * scale_ref[...] + shift_ref[...]
    y = jnp.maximum(y, 0.0)

    # 1x1 conv emitted channels-major ([Cout, sh*Wp], spatial on lanes).
    out = jax.lax.dot_general(w1t_ref[...], y, (((1,), (1,)), ((), ())),
                              preferred_element_type=jnp.float32)
    out = out + b1t_ref[...]

    nc = n_cls
    m = mask_ref[...]                                            # [1, sh*Wp]
    # Class heat-map: sigmoid + clamp; zero the junk columns so the nms kernel
    # can treat 0.0 as -inf (all real values are >= HM_CLAMP).
    hm = jnp.clip(jax.nn.sigmoid(out[:nc, :]), HM_CLAMP, 1.0 - HM_CLAMP) * m
    # Dims: sigmoid - 0.5.  Orientation: per-pixel L2 normalize (2 rows).
    dims = jax.nn.sigmoid(out[nc + 3:nc + 6, :]) - 0.5
    o0 = out[nc + 6:nc + 7, :]
    o1 = out[nc + 7:nc + 8, :]
    inv = 1.0 / jnp.maximum(jnp.sqrt(o0 * o0 + o1 * o1), NORM_EPS)

    o_ref[0:nc, :] = hm
    o_ref[nc:nc + 3, :] = out[nc:nc + 3, :]
    o_ref[nc + 3:nc + 6, :] = dims
    o_ref[nc + 6:nc + 7, :] = o0 * inv
    o_ref[nc + 7:nc + 8, :] = o1 * inv


def _nms_kernel(hm_ref, o_ref, *, wp, hwp):
    """nms_hm: separable 3x3 max-pool keep mask on the class heat-map.

    hm_ref: [n_cls, H*Wp] with the junk columns (x >= W) already zeroed, so the
    only masking needed is for the top/bottom image rows (vertical wrap).
    """
    x = hm_ref[...]
    left = pltpu.roll(x, 1, axis=1)          # value at p-1
    right = pltpu.roll(x, hwp - 1, axis=1)   # value at p+1
    h3 = jnp.maximum(x, jnp.maximum(left, right))
    up = pltpu.roll(h3, wp, axis=1)          # value at p-Wp
    down = pltpu.roll(h3, hwp - wp, axis=1)  # value at p+Wp
    pos = jax.lax.broadcasted_iota(jnp.int32, x.shape, 1)
    up = jnp.where(pos >= wp, up, 0.0)           # row 0 has no row above
    down = jnp.where(pos < hwp - wp, down, 0.0)  # row H-1 has no row below
    hmax = jnp.maximum(h3, jnp.maximum(up, down))
    # Exact float equality keep-mask, same as torch nms_hm (ties are kept).
    o_ref[...] = jnp.where(hmax == x, x, 0.0)


# --------------------------------------------------------------------------- runners
_VMEM_LIMIT = 64 * 1024 * 1024


def _run_stats(xstrips, w3, b3, colmask, *, sh, wp, cin, ch2):
    n, n_strips, win, _ = xstrips.shape
    kernel = functools.partial(_stats_kernel, sh=sh, wp=wp, cin=cin, ch2=ch2)
    return pl.pallas_call(
        kernel,
        out_shape=jax.ShapeDtypeStruct((n, 2, ch2), jnp.float32),
        grid=(n, n_strips),
        in_specs=[
            pl.BlockSpec((None, None, win, cin), lambda b, s: (b, s, 0, 0)),
            pl.BlockSpec((9 * cin, ch2), lambda b, s: (0, 0)),
            pl.BlockSpec((1, ch2), lambda b, s: (0, 0)),
            pl.BlockSpec((1, sh * wp), lambda b, s: (0, 0)),
        ],
        out_specs=pl.BlockSpec((None, 2, ch2), lambda b, s: (b, 0, 0)),
        compiler_params=pltpu.CompilerParams(
            dimension_semantics=("parallel", "arbitrary"),
            vmem_limit_bytes=_VMEM_LIMIT),
    )(xstrips, w3, b3, colmask)


def _run_head(xstrips, w3, b3, scale, shift, w1t, b1t, colmask,
              *, sh, wp, cin, ch2, n_cls):
    n, n_strips, win, _ = xstrips.shape
    cout = w1t.shape[0]
    shwp = sh * wp
    kernel = functools.partial(_head_kernel, sh=sh, wp=wp, cin=cin, ch2=ch2,
                               n_cls=n_cls)
    flops = int(n * n_strips * shwp * (2 * 9 * cin * ch2 + 2 * ch2 * cout))
    transcendentals = int(n * n_strips * shwp * 6)
    bytes_accessed = int(4 * (xstrips.size + n * n_strips * cout * shwp
                              + w3.size + scale.size + shift.size
                              + w1t.size + b3.size + b1t.size + colmask.size))
    return pl.pallas_call(
        kernel,
        out_shape=jax.ShapeDtypeStruct((n, n_strips, cout, shwp), jnp.float32),
        grid=(n, n_strips),
        in_specs=[
            pl.BlockSpec((None, None, win, cin), lambda b, s: (b, s, 0, 0)),
            pl.BlockSpec((9 * cin, ch2), lambda b, s: (0, 0)),
            pl.BlockSpec((1, ch2), lambda b, s: (0, 0)),
            pl.BlockSpec((None, 1, ch2), lambda b, s: (b, 0, 0)),
            pl.BlockSpec((None, 1, ch2), lambda b, s: (b, 0, 0)),
            pl.BlockSpec((cout, ch2), lambda b, s: (0, 0)),
            pl.BlockSpec((cout, 1), lambda b, s: (0, 0)),
            pl.BlockSpec((1, shwp), lambda b, s: (0, 0)),
        ],
        out_specs=pl.BlockSpec((None, None, cout, shwp),
                               lambda b, s: (b, s, 0, 0)),
        compiler_params=pltpu.CompilerParams(
            dimension_semantics=("parallel", "parallel"),
            vmem_limit_bytes=_VMEM_LIMIT),
        cost_estimate=pl.CostEstimate(flops=flops,
                                      transcendentals=transcendentals,
                                      bytes_accessed=bytes_accessed),
    )(xstrips, w3, b3, scale, shift, w1t, b1t, colmask)


def _run_nms(hm_flat, *, wp):
    n, n_cls, hwp = hm_flat.shape
    kernel = functools.partial(_nms_kernel, wp=wp, hwp=hwp)
    return pl.pallas_call(
        kernel,
        out_shape=jax.ShapeDtypeStruct((n, n_cls, hwp), jnp.float32),
        grid=(n,),
        in_specs=[pl.BlockSpec((None, n_cls, hwp), lambda b: (b, 0, 0))],
        out_specs=pl.BlockSpec((None, n_cls, hwp), lambda b: (b, 0, 0)),
        compiler_params=pltpu.CompilerParams(
            dimension_semantics=("parallel",),
            vmem_limit_bytes=_VMEM_LIMIT),
    )(hm_flat)


# --------------------------------------------------------------------------- module
class SMOKEHeadPallas:
    """Inference-mode SMOKEHead: fused predictor heads + nms_hm, strip-tiled."""

    def __init__(self, in_channels, head_conv=32, num_classes=3,
                 reg_channels=8, num_groups=8, strip_rows=8, key=None):
        if key is None:
            key = jax.random.PRNGKey(0)
        k = jax.random.split(key, 4)
        ch = head_conv
        self.head_conv = head_conv
        self.num_groups = num_groups
        self.num_classes = num_classes
        self.reg_channels = reg_channels
        self.strip_rows = strip_rows

        # per-head parameters (as the PyTorch SMOKEPredictor would own them)
        cls_w3 = 0.1 * jax.random.normal(k[0], (3, 3, in_channels, ch), jnp.float32)
        reg_w3 = 0.1 * jax.random.normal(k[2], (3, 3, in_channels, ch), jnp.float32)
        cls_w1 = 0.1 * jax.random.normal(k[1], (ch, num_classes), jnp.float32)
        reg_w1 = 0.1 * jax.random.normal(k[3], (ch, reg_channels), jnp.float32)

        # fused 3x3 conv: tap-major rows ((ky*3+kx)*Cin + cin), both heads on Cout
        self.w3 = jnp.concatenate([cls_w3.reshape(9 * in_channels, ch),
                                   reg_w3.reshape(9 * in_channels, ch)], axis=1)
        self.b3 = jnp.zeros((1, 2 * ch), jnp.float32)
        self.gamma = jnp.ones((1, 2 * ch), jnp.float32)
        self.beta = jnp.zeros((1, 2 * ch), jnp.float32)

        # fused 1x1 conv: block-diagonal, stored pre-transposed as [Cout, 2*Ch]
        w1_bd = jnp.zeros((2 * ch, num_classes + reg_channels), jnp.float32)
        w1_bd = w1_bd.at[:ch, :num_classes].set(cls_w1)
        w1_bd = w1_bd.at[ch:, num_classes:].set(reg_w1)
        self.w1t = w1_bd.T
        self.b1t = jnp.concatenate(
            [jnp.full((num_classes,), -2.19, jnp.float32),   # SMOKE heat-map init
             jnp.zeros((reg_channels,), jnp.float32)])[:, None]

    def __call__(self, features_nchw):
        n, c, h, w = features_nchw.shape
        sh = _pick_strip_rows(h, self.strip_rows)
        n_strips = h // sh
        wp = w + 2
        ch2 = 2 * self.head_conv
        cpg = self.head_conv // self.num_groups
        n_groups = 2 * self.num_groups

        # NCHW -> NHWC; pad 1 row top, 2 rows bottom (extra row keeps the last
        # strip's junk-column taps in bounds), 1 col left/right; flatten (y, x).
        x = jnp.transpose(features_nchw, (0, 2, 3, 1))
        xp = jnp.pad(x, ((0, 0), (1, 2), (1, 1), (0, 0)))
        xflat = xp.reshape(n, (h + 3) * wp, c)

        # Per-strip windows with a materialized 3-row halo -> non-overlapping
        # BlockSpec blocks, fully static in-kernel slicing.
        win = (sh + 3) * wp
        xstrips = jnp.stack(
            [xflat[:, s * sh * wp: s * sh * wp + win, :] for s in range(n_strips)],
            axis=1)                                          # [N, S, (sh+3)*Wp, Cin]

        # Junk-column mask (x >= W inside each Wp-wide flattened row).
        q = jnp.arange(sh * wp, dtype=jnp.int32)
        colmask = ((q % wp) < w).astype(jnp.float32).reshape(1, sh * wp)

        # ---- pass 1: global GroupNorm statistics (sum, sum of squares) ----
        stats = _run_stats(xstrips, self.w3, self.b3, colmask,
                           sh=sh, wp=wp, cin=c, ch2=ch2)
        cnt = float(h * w * cpg)
        g = stats.reshape(n, 2, n_groups, cpg).sum(-1)       # [N, 2, G]
        mean_g = g[:, 0] / cnt
        var_g = jnp.maximum(g[:, 1] / cnt - mean_g * mean_g, 0.0)
        rstd_g = jax.lax.rsqrt(var_g + GN_EPS)
        mean_c = jnp.repeat(mean_g, cpg, axis=1)             # [N, 2Ch]
        rstd_c = jnp.repeat(rstd_g, cpg, axis=1)
        scale = (self.gamma * rstd_c)[:, None, :]            # [N, 1, 2Ch]
        shift = (self.beta - self.gamma * rstd_c * mean_c)[:, None, :]

        # ---- pass 2: conv + GN + ReLU + 1x1 + per-channel epilogue ----
        out = _run_head(xstrips, self.w3, self.b3, scale, shift, self.w1t,
                        self.b1t, colmask, sh=sh, wp=wp, cin=c, ch2=ch2,
                        n_cls=self.num_classes)
        # out: [N, S, Cout, sh*Wp] -> [N, C, H*Wp] (small wrapper reshapes).
        def unstrip(t):
            return jnp.transpose(t, (0, 2, 1, 3)).reshape(n, t.shape[2], h * wp)
        hm_flat = unstrip(out[:, :, :self.num_classes, :])
        reg_flat = unstrip(out[:, :, self.num_classes:, :])

        # ---- pass 3: nms_hm on the class channels only ----
        hm_nms = _run_nms(hm_flat, wp=wp)

        hm = hm_nms.reshape(n, self.num_classes, h, wp)[..., :w]
        reg = reg_flat.reshape(n, self.reg_channels, h, wp)[..., :w]
        # TODO(synk): post_processor (top-K + 3D decode) needs camera intrinsics
        # from `targets`; returning predictor outputs after nms_hm instead.
        return [hm, reg], {}, {}


if __name__ == "__main__":
    key = jax.random.PRNGKey(0)
    k_feat, k_param = jax.random.split(key)
    features = jax.random.normal(k_feat, (2, 4, 16, 16), dtype=jnp.float32)  # NCHW

    head = SMOKEHeadPallas(in_channels=4, head_conv=32, num_classes=3,
                           reg_channels=8, num_groups=8, strip_rows=8,
                           key=k_param)
    (hm, reg), _, _ = head(features)
    jax.block_until_ready(hm)
    jax.block_until_ready(reg)

    assert hm.shape == (2, 3, 16, 16) and reg.shape == (2, 8, 16, 16)
    assert bool(jnp.all(jnp.isfinite(hm))) and bool(jnp.all(jnp.isfinite(reg)))
    # heat-map after sigmoid/clamp/nms is in [0, 1]
    assert bool(jnp.all((hm >= 0.0) & (hm <= 1.0)))
    # orientation channels are L2-normalized per pixel
    ori = reg[:, 6:8, :, :]
    ori_norm = jnp.sqrt(jnp.sum(ori * ori, axis=1))
    assert bool(jnp.all(jnp.abs(ori_norm - 1.0) < 1e-3))
    print("KERNEL_OK")
</pallas_src>

<mosaic_0001>
module attributes {stable_mosaic.version = 11 : i64} {
  func.func @_stats_kernel(%arg0: i32, %arg1: i32, %arg2: memref<1x1x198x4xf32, #tpu.memory_space<vmem>>, %arg3: memref<36x64xf32, #tpu.memory_space<vmem>>, %arg4: memref<1x64xf32, #tpu.memory_space<vmem>>, %arg5: memref<1x144xf32, #tpu.memory_space<vmem>>, %arg6: memref<1x2x64xf32, #tpu.memory_space<vmem>>) attributes {dimension_semantics = [#tpu.dimension_semantics<parallel>, #tpu.dimension_semantics<arbitrary>], iteration_bounds = array<i64: 2, 2>, scalar_prefetch = 0 : i64, scratch_operands = 0 : i64, tpu.core_type = #tpu.core_type<tc>, window_params = [{transform_indices = @transform_0, window_bounds = array<i64: 1, 1, 198, 4>}, {pipeline_mode = #tpu.pipeline_mode<synchronous>, transform_indices = @transform_1, window_bounds = array<i64: 36, 64>}, {pipeline_mode = #tpu.pipeline_mode<synchronous>, transform_indices = @transform_2, window_bounds = array<i64: 1, 64>}, {pipeline_mode = #tpu.pipeline_mode<synchronous>, transform_indices = @transform_3, window_bounds = array<i64: 1, 144>}, {transform_indices = @transform_4, window_bounds = array<i64: 1, 2, 64>}]} {
    %c0_i32 = arith.constant 0 : i32
    %0 = arith.cmpi eq, %arg1, %c0_i32 : i32
    %1 = arith.extui %0 : i1 to i32
    %c0_i32_0 = arith.constant 0 : i32
    %2 = arith.cmpi ne, %1, %c0_i32_0 : i32
    scf.if %2 {
      %cst_66 = arith.constant 0.000000e+00 : f32
      %86 = vector.broadcast %cst_66 : f32 to vector<2x64xf32>
      %c0_67 = arith.constant 0 : index
      %c0_68 = arith.constant 0 : index
      %c0_69 = arith.constant 0 : index
      %87 = vector.load %arg6[%c0_67, %c0_68, %c0_69] : memref<1x2x64xf32, #tpu.memory_space<vmem>>, vector<1x2x64xf32>
      %88 = vector.shape_cast %87 : vector<1x2x64xf32> to vector<2x64xf32>
      %89 = vector.shape_cast %86 : vector<2x64xf32> to vector<1x2x64xf32>
      tpu.vector_store %arg6[%c0_67, %c0_68, %c0_69], %89 {strides = array<i32>} : memref<1x2x64xf32, #tpu.memory_space<vmem>>, vector<1x2x64xf32>,
    } else {
    }
    %cst = arith.constant 0.000000e+00 : f32
    %3 = vector.broadcast %cst : f32 to vector<144x64xf32>
    %c0 = arith.constant 0 : index
    %c0_1 = arith.constant 0 : index
    %c0_2 = arith.constant 0 : index
    %c0_3 = arith.constant 0 : index
    %4 = vector.load %arg2[%c0, %c0_1, %c0_2, %c0_3] : memref<1x1x198x4xf32, #tpu.memory_space<vmem>>, vector<1x1x144x4xf32>
    %5 = vector.shape_cast %4 : vector<1x1x144x4xf32> to vector<144x4xf32>
    %6 = arith.truncf %5 : vector<144x4xf32> to vector<144x4xbf16>
    %c0_4 = arith.constant 0 : index
    %c0_5 = arith.constant 0 : index
    %7 = vector.load %arg3[%c0_4, %c0_5] : memref<36x64xf32, #tpu.memory_space<vmem>>, vector<4x64xf32>
    %8 = arith.truncf %7 : vector<4x64xf32> to vector<4x64xbf16>
    %cst_6 = arith.constant dense<0.000000e+00> : vector<144x64xf32>
    %9 = tpu.matmul %6, %8, %cst_6 {dimension_numbers = #tpu.dot_dimension_numbers<[1], [0], [0], [1], [0, 0, 1, 1], [], []>} : vector<144x4xbf16>, vector<4x64xbf16>, vector<144x64xf32> -> vector<144x64xf32>
    %10 = arith.addf %3, %9 : vector<144x64xf32>
    %c0_7 = arith.constant 0 : index
    %c0_8 = arith.constant 0 : index
    %c1 = arith.constant 1 : index
    %c0_9 = arith.constant 0 : index
    %11 = vector.load %arg2[%c0_7, %c0_8, %c1, %c0_9] : memref<1x1x198x4xf32, #tpu.memory_space<vmem>>, vector<1x1x144x4xf32>
    %12 = vector.shape_cast %11 : vector<1x1x144x4xf32> to vector<144x4xf32>
    %13 = arith.truncf %12 : vector<144x4xf32> to vector<144x4xbf16>
    %c4 = arith.constant 4 : index
    %c0_10 = arith.constant 0 : index
    %14 = vector.load %arg3[%c4, %c0_10] : memref<36x64xf32, #tpu.memory_space<vmem>>, vector<4x64xf32>
    %15 = arith.truncf %14 : vector<4x64xf32> to vector<4x64xbf16>
    %cst_11 = arith.constant dense<0.000000e+00> : vector<144x64xf32>
    %16 = tpu.matmul %13, %15, %cst_11 {dimension_numbers = #tpu.dot_dimension_numbers<[1], [0], [0], [1], [0, 0, 1, 1], [], []>} : vector<144x4xbf16>, vector<4x64xbf16>, vector<144x64xf32> -> vector<144x64xf32>
    %17 = arith.addf %10, %16 : vector<144x64xf32>
    %c0_12 = arith.constant 0 : index
    %c0_13 = arith.constant 0 : index
    %c2 = arith.constant 2 : index
    %c0_14 = arith.constant 0 : index
    %18 = vector.load %arg2[%c0_12, %c0_13, %c2, %c0_14] : memref<1x1x198x4xf32, #tpu.memory_space<vmem>>, vector<1x1x144x4xf32>
    %19 = vector.shape_cast %18 : vector<1x1x144x4xf32> to vector<144x4xf32>
    %20 = arith.truncf %19 : vector<144x4xf32> to vector<144x4xbf16>
    %c8 = arith.constant 8 : index
    %c0_15 = arith.constant 0 : index
    %21 = vector.load %arg3[%c8, %c0_15] : memref<36x64xf32, #tpu.memory_space<vmem>>, vector<4x64xf32>
    %22 = arith.truncf %21 : vector<4x64xf32> to vector<4x64xbf16>
    %cst_16 = arith.constant dense<0.000000e+00> : vector<144x64xf32>
    %23 = tpu.matmul %20, %22, %cst_16 {dimension_numbers = #tpu.dot_dimension_numbers<[1], [0], [0], [1], [0, 0, 1, 1], [], []>} : vector<144x4xbf16>, vector<4x64xbf16>, vector<144x64xf32> -> vector<144x64xf32>
    %24 = arith.addf %17, %23 : vector<144x64xf32>
    %c0_17 = arith.constant 0 : index
    %c0_18 = arith.constant 0 : index
    %c18 = arith.constant 18 : index
    %c0_19 = arith.constant 0 : index
    %25 = vector.load %arg2[%c0_17, %c0_18, %c18, %c0_19] : memref<1x1x198x4xf32, #tpu.memory_space<vmem>>, vector<1x1x144x4xf32>
    %26 = vector.shape_cast %25 : vector<1x1x144x4xf32> to vector<144x4xf32>
    %27 = arith.truncf %26 : vector<144x4xf32> to vector<144x4xbf16>
    %c12 = arith.constant 12 : index
    %c0_20 = arith.constant 0 : index
    %28 = vector.load %arg3[%c12, %c0_20] : memref<36x64xf32, #tpu.memory_space<vmem>>, vector<4x64xf32>
    %29 = arith.truncf %28 : vector<4x64xf32> to vector<4x64xbf16>
    %cst_21 = arith.constant dense<0.000000e+00> : vector<144x64xf32>
    %30 = tpu.matmul %27, %29, %cst_21 {dimension_numbers = #tpu.dot_dimension_numbers<[1], [0], [0], [1], [0, 0, 1, 1], [], []>} : vector<144x4xbf16>, vector<4x64xbf16>, vector<144x64xf32> -> vector<144x64xf32>
    %31 = arith.addf %24, %30 : vector<144x64xf32>
    %c0_22 = arith.constant 0 : index
    %c0_23 = arith.constant 0 : index
    %c19 = arith.constant 19 : index
    %c0_24 = arith.constant 0 : index
    %32 = vector.load %arg2[%c0_22, %c0_23, %c19, %c0_24] : memref<1x1x198x4xf32, #tpu.memory_space<vmem>>, vector<1x1x144x4xf32>
    %33 = vector.shape_cast %32 : vector<1x1x144x4xf32> to vector<144x4xf32>
    %34 = arith.truncf %33 : vector<144x4xf32> to vector<144x4xbf16>
    %c16 = arith.constant 16 : index
    %c0_25 = arith.constant 0 : index
    %35 = vector.load %arg3[%c16, %c0_25] : memref<36x64xf32, #tpu.memory_space<vmem>>, vector<4x64xf32>
    %36 = arith.truncf %35 : vector<4x64xf32> to vector<4x64xbf16>
    %cst_26 = arith.constant dense<0.000000e+00> : vector<144x64xf32>
    %37 = tpu.matmul %34, %36, %cst_26 {dimension_numbers = #tpu.dot_dimension_numbers<[1], [0], [0], [1], [0, 0, 1, 1], [], []>} : vector<144x4xbf16>, vector<4x64xbf16>, vector<144x64xf32> -> vector<144x64xf32>
    %38 = arith.addf %31, %37 : vector<144x64xf32>
    %c0_27 = arith.constant 0 : index
    %c0_28 = arith.constant 0 : index
    %c20 = arith.constant 20 : index
    %c0_29 = arith.constant 0 : index
    %39 = vector.load %arg2[%c0_27, %c0_28, %c20, %c0_29] : memref<1x1x198x4xf32, #tpu.memory_space<vmem>>, vector<1x1x144x4xf32>
    %40 = vector.shape_cast %39 : vector<1x1x144x4xf32> to vector<144x4xf32>
    %41 = arith.truncf %40 : vector<144x4xf32> to vector<144x4xbf16>
    %c20_30 = arith.constant 20 : index
    %c0_31 = arith.constant 0 : index
    %42 = vector.load %arg3[%c20_30, %c0_31] : memref<36x64xf32, #tpu.memory_space<vmem>>, vector<4x64xf32>
    %43 = arith.truncf %42 : vector<4x64xf32> to vector<4x64xbf16>
    %cst_32 = arith.constant dense<0.000000e+00> : vector<144x64xf32>
    %44 = tpu.matmul %41, %43, %cst_32 {dimension_numbers = #tpu.dot_dimension_numbers<[1], [0], [0], [1], [0, 0, 1, 1], [], []>} : vector<144x4xbf16>, vector<4x64xbf16>, vector<144x64xf32> -> vector<144x64xf32>
    %45 = arith.addf %38, %44 : vector<144x64xf32>
    %c0_33 = arith.constant 0 : index
    %c0_34 = arith.constant 0 : index
    %c36 = arith.constant 36 : index
    %c0_35 = arith.constant 0 : index
    %46 = vector.load %arg2[%c0_33, %c0_34, %c36, %c0_35] : memref<1x1x198x4xf32, #tpu.memory_space<vmem>>, vector<1x1x144x4xf32>
    %47 = vector.shape_cast %46 : vector<1x1x144x4xf32> to vector<144x4xf32>
    %48 = arith.truncf %47 : vector<144x4xf32> to vector<144x4xbf16>
    %c24 = arith.constant 24 : index
    %c0_36 = arith.constant 0 : index
    %49 = vector.load %arg3[%c24, %c0_36] : memref<36x64xf32, #tpu.memory_space<vmem>>, vector<4x64xf32>
    %50 = arith.truncf %49 : vector<4x64xf32> to vector<4x64xbf16>
    %cst_37 = arith.constant dense<0.000000e+00> : vector<144x64xf32>
    %51 = tpu.matmul %48, %50, %cst_37 {dimension_numbers = #tpu.dot_dimension_numbers<[1], [0], [0], [1], [0, 0, 1, 1], [], []>} : vector<144x4xbf16>, vector<4x64xbf16>, vector<144x64xf32> -> vector<144x64xf32>
    %52 = arith.addf %45, %51 : vector<144x64xf32>
    %c0_38 = arith.constant 0 : index
    %c0_39 = arith.constant 0 : index
    %c37 = arith.constant 37 : index
    %c0_40 = arith.constant 0 : index
    %53 = vector.load %arg2[%c0_38, %c0_39, %c37, %c0_40] : memref<1x1x198x4xf32, #tpu.memory_space<vmem>>, vector<1x1x144x4xf32>
    %54 = vector.shape_cast %53 : vector<1x1x144x4xf32> to vector<144x4xf32>
    %55 = arith.truncf %54 : vector<144x4xf32> to vector<144x4xbf16>
    %c28 = arith.constant 28 : index
    %c0_41 = arith.constant 0 : index
    %56 = vector.load %arg3[%c28, %c0_41] : memref<36x64xf32, #tpu.memory_space<vmem>>, vector<4x64xf32>
    %57 = arith.truncf %56 : vector<4x64xf32> to vector<4x64xbf16>
    %cst_42 = arith.constant dense<0.000000e+00> : vector<144x64xf32>
    %58 = tpu.matmul %55, %57, %cst_42 {dimension_numbers = #tpu.dot_dimension_numbers<[1], [0], [0], [1], [0, 0, 1, 1], [], []>} : vector<144x4xbf16>, vector<4x64xbf16>, vector<144x64xf32> -> vector<144x64xf32>
    %59 = arith.addf %52, %58 : vector<144x64xf32>
    %c0_43 = arith.constant 0 : index
    %c0_44 = arith.constant 0 : index
    %c38 = arith.constant 38 : index
    %c0_45 = arith.constant 0 : index
    %60 = vector.load %arg2[%c0_43, %c0_44, %c38, %c0_45] : memref<1x1x198x4xf32, #tpu.memory_space<vmem>>, vector<1x1x144x4xf32>
    %61 = vector.shape_cast %60 : vector<1x1x144x4xf32> to vector<144x4xf32>
    %62 = arith.truncf %61 : vector<144x4xf32> to vector<144x4xbf16>
    %c32 = arith.constant 32 : index
    %c0_46 = arith.constant 0 : index
    %63 = vector.load %arg3[%c32, %c0_46] : memref<36x64xf32, #tpu.memory_space<vmem>>, vector<4x64xf32>
    %64 = arith.truncf %63 : vector<4x64xf32> to vector<4x64xbf16>
    %cst_47 = arith.constant dense<0.000000e+00> : vector<144x64xf32>
    %65 = tpu.matmul %62, %64, %cst_47 {dimension_numbers = #tpu.dot_dimension_numbers<[1], [0], [0], [1], [0, 0, 1, 1], [], []>} : vector<144x4xbf16>, vector<4x64xbf16>, vector<144x64xf32> -> vector<144x64xf32>
    %66 = arith.addf %59, %65 : vector<144x64xf32>
    %c0_48 = arith.constant 0 : index
    %c0_49 = arith.constant 0 : index
    %67 = vector.load %arg4[%c0_48, %c0_49] : memref<1x64xf32, #tpu.memory_space<vmem>>, vector<1x64xf32>
    %68 = vector.broadcast %67 : vector<1x64xf32> to vector<144x64xf32>
    %69 = arith.addf %66, %68 : vector<144x64xf32>
    %c0_50 = arith.constant 0 : index
    %c0_51 = arith.constant 0 : index
    %70 = vector.load %arg5[%c0_50, %c0_51] : memref<1x144xf32, #tpu.memory_space<vmem>>, vector<1x144xf32>
    %cst_52 = arith.constant dense<0.000000e+00> : vector<1x64xf32>
    %71 = tpu.matmul %70, %69, %cst_52 {dimension_numbers = #tpu.dot_dimension_numbers<[1], [0], [0], [1], [0, 0, 1, 1], [], []>} : vector<1x144xf32>, vector<144x64xf32>, vector<1x64xf32> -> vector<1x64xf32>
    %72 = arith.mulf %69, %69 : vector<144x64xf32>
    %cst_53 = arith.constant dense<0.000000e+00> : vector<1x64xf32>
    %73 = tpu.matmul %70, %72, %cst_53 {dimension_numbers = #tpu.dot_dimension_numbers<[1], [0], [0], [1], [0, 0, 1, 1], [], []>} : vector<1x144xf32>, vector<144x64xf32>, vector<1x64xf32> -> vector<1x64xf32>
    %c0_54 = arith.constant 0 : index
    %c0_55 = arith.constant 0 : index
    %c0_56 = arith.constant 0 : index
    %74 = vector.load %arg6[%c0_54, %c0_55, %c0_56] : memref<1x2x64xf32, #tpu.memory_space<vmem>>, vector<1x1x64xf32>
    %75 = vector.shape_cast %74 : vector<1x1x64xf32> to vector<1x64xf32>
    %76 = arith.addf %75, %71 : vector<1x64xf32>
    %c0_57 = arith.constant 0 : index
    %c0_58 = arith.constant 0 : index
    %c0_59 = arith.constant 0 : index
    %77 = vector.load %arg6[%c0_57, %c0_58, %c0_59] : memref<1x2x64xf32, #tpu.memory_space<vmem>>, vector<1x1x64xf32>
    %78 = vector.shape_cast %77 : vector<1x1x64xf32> to vector<1x64xf32>
    %79 = vector.shape_cast %76 : vector<1x64xf32> to vector<1x1x64xf32>
    tpu.vector_store %arg6[%c0_57, %c0_58, %c0_59], %79 {strides = array<i32>} : memref<1x2x64xf32, #tpu.memory_space<vmem>>, vector<1x1x64xf32>,
    %c0_60 = arith.constant 0 : index
    %c1_61 = arith.constant 1 : index
    %c0_62 = arith.constant 0 : index
    %80 = vector.load %arg6[%c0_60, %c1_61, %c0_62] : memref<1x2x64xf32, #tpu.memory_space<vmem>>, vector<1x1x64xf32>
    %81 = vector.shape_cast %80 : vector<1x1x64xf32> to vector<1x64xf32>
    %82 = arith.addf %81, %73 : vector<1x64xf32>
    %c0_63 = arith.constant 0 : index
    %c1_64 = arith.constant 1 : index
    %c0_65 = arith.constant 0 : index
    %83 = vector.load %arg6[%c0_63, %c1_64, %c0_65] : memref<1x2x64xf32, #tpu.memory_space<vmem>>, vector<1x1x64xf32>
    %84 = vector.shape_cast %83 : vector<1x1x64xf32> to vector<1x64xf32>
    %85 = vector.shape_cast %82 : vector<1x64xf32> to vector<1x1x64xf32>
    tpu.vector_store %arg6[%c0_63, %c1_64, %c0_65], %85 {strides = array<i32>} : memref<1x2x64xf32, #tpu.memory_space<vmem>>, vector<1x1x64xf32>,
    return
  }
  func.func @transform_0(%arg0: i32, %arg1: i32) -> (i32, i32, i32, i32) {
    %c0_i32 = arith.constant 0 : i32
    %c0_i32_0 = arith.constant 0 : i32
    %c0_i32_1 = arith.constant 0 : i32
    return %arg0, %arg1, %c0_i32, %c0_i32_0 : i32, i32, i32, i32
  }
  func.func @transform_1(%arg0: i32, %arg1: i32) -> (i32, i32) {
    %c0_i32 = arith.constant 0 : i32
    %c0_i32_0 = arith.constant 0 : i32
    %c0_i32_1 = arith.constant 0 : i32
    return %c0_i32, %c0_i32_0 : i32, i32
  }
  func.func @transform_2(%arg0: i32, %arg1: i32) -> (i32, i32) {
    %c0_i32 = arith.constant 0 : i32
    %c0_i32_0 = arith.constant 0 : i32
    %c0_i32_1 = arith.constant 0 : i32
    return %c0_i32, %c0_i32_0 : i32, i32
  }
  func.func @transform_3(%arg0: i32, %arg1: i32) -> (i32, i32) {
    %c0_i32 = arith.constant 0 : i32
    %c0_i32_0 = arith.constant 0 : i32
    %c0_i32_1 = arith.constant 0 : i32
    return %c0_i32, %c0_i32_0 : i32, i32
  }
  func.func @transform_4(%arg0: i32, %arg1: i32) -> (i32, i32, i32) {
    %c0_i32 = arith.constant 0 : i32
    %c0_i32_0 = arith.constant 0 : i32
    %c0_i32_1 = arith.constant 0 : i32
    return %arg0, %c0_i32, %c0_i32_0 : i32, i32, i32
  }
}

</mosaic_0001>

<bundles_post_ra>
// kernel: tpu_custom_call.1
= control target key start
LH: loop header
LB: loop body
LE: loop exit
PB: predicated region body
PF: predicated region fallthrough
CT: control target
= control target key end

     0   :  { %9 = vsyncpa [#allocation3], 0  ;;  %s3782_s0 = inlined_call_operand.vmem [shape: f32[2,2,198,4], index: 0, kind: input, shape index: {}]   ;;  %s3783_s1 = inlined_call_operand.vmem [shape: f32[36,64], index: 1, kind: input, shape index: {}]   ;;  %s3784_s2 = inlined_call_operand.vmem [shape: f32[1,64], index: 2, kind: input, shape index: {}]   ;;  %s3785_s3 = inlined_call_operand.vmem [shape: f32[1,144], index: 3, kind: input, shape index: {}]   ;;  %s3786_s4 = inlined_call_operand.hbm [shape: f32[2,2,64], index: 4, kind: output, shape index: {}]  }
   0x1   :  { %11 = vsyncpa [#allocation3 + $0x1], 0  ;;  %s2859_s15 = smov 0   ;;  %s2861_s16 = smov 0  }
   0x2   :  { %s2863_s17 = smov 0   ;;  %s2865_s18 = smov 0  }
   0x3   :  { %s2867_s19 = smov 0   ;;  %s2869_s20 = smov 0  }
   0x4   :  { %s2871_s21 = smov 0   ;;  %s2873_s22 = smov 0  }
   0x5 LB: > { %s2130_s23 = sadd.s32 4294967295, %s2828_s22   ;;  %s2131_s24 = sadd.s32 4294967294, %s2828_s22   ;;  %s2828_s22 = sphi %s2873_s22, %s17_s22   ;;  %s2824_s21 = sphi %s2871_s21, %s3795_s21   ;;  %s2820_s20 = sphi %s2869_s20, %s3794_s20   ;;  %s2816_s19 = sphi %s2867_s19, %s3793_s19   ;;  %s2812_s18 = sphi %s2865_s18, %s3792_s18   ;;  %s2808_s17 = sphi %s2863_s17, %s3791_s17   ;;  %s2804_s16 = sphi %s2861_s16, %s3790_s16   ;;  %s2800_s15 = sphi %s2859_s15, %s3789_s15  }
   0x6   : > { %s26_s25 = sadd.s32 1, %s2820_s20  ;;  %s29_s26 = sadd.s32 1, %s2824_s21 }
   0x7   : > { %p27_p0 = scmp.ge.s32.totalorder %s26_s25, 2  ;;  %p137_p1 = scmp.ne.s32.totalorder %s2808_s17, %s2804_s16 }
   0x8   : > { %p138_p2 = scmp.eq.s32.totalorder %s2130_s23, 3  ;;  %p143_p4 = scmp.ne.s32.totalorder %s2804_s16, %s2800_s15 }
   0x9   : > { %s3797_s25 = smov (%p27_p0, %s26_s25), 0  ;;  %s3799_s26 = smov (!%p27_p0, %s29_s26), %s2824_s21 }
   0xa   : > { %p2908_p3 = por %p138_p2, %p137_p1  ;;  %p31_p5 = scmp.ge.s32.totalorder %s3799_s26, 2 }
   0xb   : > { %p144_p6 = scmp.eq.s32.totalorder %s2131_s24, 3  ;;  %p2134_p7 = scmp.ge.s32.totalorder %s2828_s22, 1 }
   0xc   : > { %p183_p8 = scmp.lt.s32.totalorder %s2828_s22, 5  ;;  %s3801_s26 = smov (%p31_p5, %s3799_s26), 0 }
   0xd   : > { %p2918_p9 = por %p144_p6, %p143_p4  ;;  %s124_s29 = ssub.s32 %s2824_s21, %s3801_s26 }
   0xe   : > { %p184_p10 = pnand %p2134_p7, %p183_p8  ;;  %s127_s30 = sadd.s32 1, %s2808_s17 }
   0xf   : > { %p125_p11 = scmp.eq.s32.totalorder %s124_s29, 0  ;;  %s210_s6 = sand.u32 (!%p184_p10), 1, %s2804_s16  }
  0x10   : > { %187 = sbr.rel (%p184_p10) target bundleno = 847 (0x34f), region = 36  ;;  %p213_p12 = scmp.lt.s32.totalorder (!%p184_p10), %s2816_s19, 1 }
  0x11   : > { %s2926_s5 = scalar_select %p125_p11, %s2808_s17, %s127_s30  }
  0x12   : > { %s2135_s7 = sshll.u32 (!%p184_p10), %s210_s6, 1  ;;  %p215_p13 = scmp.lt.s32.totalorder (!%p184_p10), %s2812_s18, 1 }
  0x13   : > { %s2940_s29 = scalar_lea.vmem (!%p184_p10), [#allocation2], %s2135_s7  ;;  %p2137_p0 = scmp.ne.s32.totalorder (!%p184_p10), %s2812_s18, 0 }
  0x15   : > { %s214_s8 = scalar_select %p213_p12, %s2816_s19, 1 }
  0x16   : > { %s216_s9 = scalar_select %p215_p13, %s2812_s18, 1 }
  0x17   : > { %s2661_s10 = smul.u32 50, %s214_s8 }
  0x18   : > { %s2660_s11 = smul.u32 25, %s216_s9 }
  0x19   : > { %226 = sbr.rel (%p2137_p0) target bundleno = 32 (0x20), region = 40 }
  0x1a   : > { %s219_s12 = sadd.s32 %s2661_s10, %s2660_s11 }
  0x1b   : > { %s2136_s13 = sshll.u32 %s219_s12, 3 }
  0x1c   : > { %s2938_s24 = scalar_lea.vmem %s3782_s0, %s2136_s13 }
  0x1e   : > { %vm227_vm0 = vcmask 517120   ;;  %v2830_v0 = vmov 0.0  }
  0x1f   : > { %228 = vst.msk [vmem:[%s2940_s29] sm:$0x3] %vm227_vm0, %v2830_v0 }
  0x20 PF: > { %v285_v1 = vld [vmem:[%s3783_s1 + $0x4] sm:$0xf]  ;;  %vm315_vm1 = vcmask 1041408   ;;  %v2831_v3 = vmov 0.0   ;;  %v259_v5 = vld [vmem:[%s2938_s24 + $0x9] sm:$0xff]  ;;  %v272_v6 = vld [vmem:[%s2938_s24 + $0x71] sm:$0xff] }
  0x21   : > { %v258_v2 = vld [vmem:[%s2938_s24 + $0x1] sm:$0xff]  ;;  %2316 = vmatprep.subr.bf16.mxu0 %v2831_v3  ;;  %2658 = vmatprep.subr.bf16.mxu1 %v2831_v3  ;;  %v286_v4 = vpack.c.bf16 %v285_v1, %v285_v1  ;;  %v273_v7 = vld [vmem:[%s2938_s24 + $0x79] sm:$0xff]  ;;  %vm2832_vm2 = vmmov 0   ;;  %vm287_vm3 = vcmask 31744   ;;  %v260_v14 = vld [vmem:[%s2938_s24 + $0x11] sm:$0xff]  ;;  %vm1869_vm4 = vcmask 130048  }
  0x22   : > { %2318 = vmatprep.mubr.msk.bf16.mxu0 %vm2832_vm2, %v2831_v3  ;;  %2346 = vmatprep.mubr.msk.bf16.mxu1 %vm2832_vm2, %v2831_v3  ;;  %v276_v9 = vpack.c.bf16 %v259_v5, %v258_v2  ;;  %v283_v10 = vpack.c.bf16 %v273_v7, %v272_v6  ;;  %v256_v11 = vld [vmem:[%s3783_s1] sm:$0xf]  ;;  %v586_v15 = vld [vmem:[%s3783_s1 + $0x8] sm:$0xf]  ;;  %v768_v27 = vld [vmem:[%s3783_s1 + $0xc] sm:$0xf] }
  0x23   : > { %v317_v8 = vsel %vm315_vm1, %v286_v4, 0  ;;  %v257_v12 = vpack.c.bf16 %v256_v11, %v256_v11  ;;  %v261_v16 = vld [vmem:[%s2938_s24 + $0x19] sm:$0xff]  ;;  %v274_v17 = vld [vmem:[%s2938_s24 + $0x81] sm:$0xff]  ;;  %v275_v18 = vld [vmem:[%s2938_s24 + $0x89] sm:$0xff]  ;;  %v587_v19 = vpack.c.bf16 %v586_v15, %v586_v15  ;;  %v769_v28 = vpack.c.bf16 %v768_v27, %v768_v27  ;;  %s2223_s23 = sshll.u32 %s2816_s19, 5  ;;  %s2051_s30 = sshll.u32 %s2940_s29, 4  ;;  %s2052_s30 = int_to_ptr.vmem [resolvable:$true] %s2051_s30 }
  0x24   : > { %2317 = vmatpush3.bf16.msra.mxu0 %v317_v8  ;;  %2659 = vmatpush3.bf16.msra.mxu1 %v317_v8  ;;  %v277_v21 = vpack.c.bf16 %v261_v16, %v260_v14  ;;  %v284_v22 = vpack.c.bf16 %v275_v18, %v274_v17  ;;  %v262_v23 = vld [vmem:[%s2938_s24 + $0x21] sm:$0xff]  ;;  %v263_v24 = vld [vmem:[%s2938_s24 + $0x29] sm:$0xff]  ;;  %v264_v32 = vld [vmem:[%s2938_s24 + $0x31] sm:$0xff]  ;;  %vm2032_vm5 = vcmask 516096   ;;  %s3733_s7 = scalar_lea.hbm %s3786_s4, %s2223_s23  ;;  %s2038_s9 = scalar_lea.sflag [#allocation3], %s210_s6 }
  0x25   : > { %2354 = vmatprep.subr.bf16.mxu1 %v2831_v3  ;;  %2392 = vmatprep.subr.bf16.mxu0 %v2831_v3  ;;  %v452_v13 = vsel %vm315_vm1, %v257_v12, 0  ;;  %v616_v20 = vsel %vm315_vm1, %v587_v19, 0  ;;  %v229_v25 = vld [vmem:[%s2938_s24] sm:$0xff]  ;;  %v230_v26 = vld [vmem:[%s2938_s24 + $0x8] sm:$0xff]  ;;  %v278_v29 = vpack.c.bf16 %v263_v24, %v262_v23  ;;  %v798_v31 = vsel %vm315_vm1, %v769_v28, 0  ;;  %v231_v34 = vld [vmem:[%s2938_s24 + $0x10] sm:$0xff] }
  0x26   : > { %v247_v30 = vpack.c.bf16 %v230_v26, %v229_v25  ;;  %v265_v33 = vld [vmem:[%s2938_s24 + $0x39] sm:$0xff]  ;;  %v266_v38 = vld [vmem:[%s2938_s24 + $0x41] sm:$0xff]  ;;  %v267_v39 = vld [vmem:[%s2938_s24 + $0x49] sm:$0xff]  ;;  %s2736_s10 = scalar_lea.vmem %s2052_s30, 32  ;;  %s2833_s11 = smov [#allocation2]  }
  0x27   : > { %2319 = vmatmul.mubr.msk.bf16.vlgmr.msra.gmra.mxu0 %vm287_vm3, %v276_v9  ;;  %2347 = vmatmul.mubr.msk.bf16.vlgmr.msra.gmra.mxu1 %vm287_vm3, %v283_v10  ;;  %v232_v35 = vld [vmem:[%s2938_s24 + $0x18] sm:$0xff]  ;;  %v279_v36 = vpack.c.bf16 %v265_v33, %v264_v32  ;;  %v233_v40 = vld [vmem:[%s2938_s24 + $0x20] sm:$0xff]  ;;  %v234_v41 = vld [vmem:[%s2938_s24 + $0x28] sm:$0xff]  ;;  %v280_v42 = vpack.c.bf16 %v267_v39, %v266_v38  ;;  %p2737_p1 = scmp.ne.s32.totalorder %s2052_s30, %s2736_s10  ;;  %s2740_s19 = sshll.u32 %s2833_s11, 4  ;;  %s2741_s19 = int_to_ptr.vmem [resolvable:$false] %s2740_s19 }
  0x28   : > { %2322 = vmatprep.mubr.msk.bf16.mxu0 %vm2832_vm2, %v2831_v3  ;;  %2350 = vmatprep.mubr.msk.bf16.mxu1 %vm2832_vm2, %v2831_v3  ;;  %v248_v37 = vpack.c.bf16 %v232_v35, %v231_v34  ;;  %v249_v43 = vpack.c.bf16 %v234_v41, %v233_v40  ;;  %v268_v44 = vld [vmem:[%s2938_s24 + $0x51] sm:$0xff]  ;;  %v269_v45 = vld [vmem:[%s2938_s24 + $0x59] sm:$0xff]  ;;  %v270_v50 = vld [vmem:[%s2938_s24 + $0x61] sm:$0xff]  ;;  %p2743_p5 = scmp.lt.s32.totalorder %s2052_s30, %s2741_s19 }
  0x29   : > { %2355 = vmatpush3.bf16.msra.mxu1 %v452_v13  ;;  %2393 = vmatpush3.bf16.msra.mxu0 %v616_v20  ;;  %v235_v46 = vld [vmem:[%s2938_s24 + $0x30] sm:$0xff]  ;;  %v236_v47 = vld [vmem:[%s2938_s24 + $0x38] sm:$0xff]  ;;  %v281_v48 = vpack.c.bf16 %v269_v45, %v268_v44  ;;  %v237_v52 = vld [vmem:[%s2938_s24 + $0x40] sm:$0xff]  ;;  %p2738_p2 = pnand %p2737_p1, %p2908_p3 }
  0x2a   : > { %2430 = vmatprep.subr.bf16.mxu1 %v2831_v3  ;;  %2468 = vmatprep.subr.bf16.mxu0 %v2831_v3  ;;  %v250_v49 = vpack.c.bf16 %v236_v47, %v235_v46  ;;  %v271_v51 = vld [vmem:[%s2938_s24 + $0x69] sm:$0xff]  ;;  %v240_v58 = vld [vmem:[%s2938_s24 + $0x58] sm:$0xff]  ;;  %v241_v1 = vld [vmem:[%s2938_s24 + $0x60] sm:$0xff] }
  0x2b   : > { %v238_v53 = vld [vmem:[%s2938_s24 + $0x48] sm:$0xff]  ;;  %v282_v54 = vpack.c.bf16 %v271_v51, %v270_v50  ;;  %v239_v56 = vld [vmem:[%s2938_s24 + $0x50] sm:$0xff]  ;;  %v562_v5 = vld [vmem:[%s2938_s24 + $0x1a] sm:$0xff]  ;;  %p2739_p4 = pneg %p2738_p2 }
  0x2c   : > { %v251_v55 = vpack.c.bf16 %v238_v53, %v237_v52  ;;  %v950_v57 = vld [vmem:[%s3783_s1 + $0x10] sm:$0xf]  ;;  %v559_v59 = vld [vmem:[%s2938_s24 + $0x2] sm:$0xff]  ;;  %v252_v62 = vpack.c.bf16 %v240_v58, %v239_v56  ;;  %v244_v9 = vld [vmem:[%s2938_s24 + $0x78] sm:$0xff] }
  0x2d   : > { %v560_v60 = vld [vmem:[%s2938_s24 + $0xa] sm:$0xff]  ;;  %v951_v61 = vpack.c.bf16 %v950_v57, %v950_v57  ;;  %v561_v4 = vld [vmem:[%s2938_s24 + $0x12] sm:$0xff]  ;;  %v563_v10 = vld [vmem:[%s2938_s24 + $0x22] sm:$0xff] }
  0x2e   : > { %v577_v63 = vpack.c.bf16 %v560_v60, %v559_v59  ;;  %v242_v2 = vld [vmem:[%s2938_s24 + $0x68] sm:$0xff]  ;;  %v578_v7 = vpack.c.bf16 %v562_v5, %v561_v4  ;;  %v243_v8 = vld [vmem:[%s2938_s24 + $0x70] sm:$0xff]  ;;  %v245_v14 = vld [vmem:[%s2938_s24 + $0x80] sm:$0xff] }
  0x2f   : > { %2323 = vmatmul.mubr.msk.bf16.gmra.mxu0 %vm287_vm3, %v277_v21  ;;  %2351 = vmatmul.mubr.msk.bf16.gmra.mxu1 %vm287_vm3, %v284_v22  ;;  %v980_v0 = vsel %vm315_vm1, %v951_v61, 0  ;;  %v253_v6 = vpack.c.bf16 %v242_v2, %v241_v1  ;;  %v564_v11 = vld [vmem:[%s2938_s24 + $0x2a] sm:$0xff]  ;;  %v254_v12 = vpack.c.bf16 %v244_v9, %v243_v8  ;;  %v565_v16 = vld [vmem:[%s2938_s24 + $0x32] sm:$0xff]  ;;  %v566_v17 = vld [vmem:[%s2938_s24 + $0x3a] sm:$0xff] }
  0x30   : > { %2326 = vmatprep.mubr.msk.bf16.mxu0 %vm2832_vm2, %v2831_v3  ;;  %2356 = vmatprep.mubr.msk.bf16.mxu1 %vm2832_vm2, %v2831_v3  ;;  %v579_v13 = vpack.c.bf16 %v564_v11, %v563_v10  ;;  %v246_v15 = vld [vmem:[%s2938_s24 + $0x88] sm:$0xff]  ;;  %v580_v19 = vpack.c.bf16 %v566_v17, %v565_v16  ;;  %v1132_v20 = vld [vmem:[%s3783_s1 + $0x14] sm:$0xf]  ;;  %v570_v27 = vld [vmem:[%s2938_s24 + $0x5a] sm:$0xff] }
  0x31   : > { %v255_v18 = vpack.c.bf16 %v246_v15, %v245_v14  ;;  %v567_v21 = vld [vmem:[%s2938_s24 + $0x42] sm:$0xff]  ;;  %v568_v22 = vld [vmem:[%s2938_s24 + $0x4a] sm:$0xff]  ;;  %v1133_v23 = vpack.c.bf16 %v1132_v20, %v1132_v20  ;;  %v569_v26 = vld [vmem:[%s2938_s24 + $0x52] sm:$0xff] }
  0x32   : > { %v581_v24 = vpack.c.bf16 %v568_v22, %v567_v21  ;;  %v582_v28 = vpack.c.bf16 %v570_v27, %v569_v26  ;;  %v573_v32 = vld [vmem:[%s2938_s24 + $0x72] sm:$0xff]  ;;  %v574_v33 = vld [vmem:[%s2938_s24 + $0x7a] sm:$0xff]  ;;  %v575_v35 = vld [vmem:[%s2938_s24 + $0x82] sm:$0xff] }
  0x33   : > { %v1162_v25 = vsel %vm315_vm1, %v1133_v23, 0  ;;  %v584_v34 = vpack.c.bf16 %v574_v33, %v573_v32  ;;  %v1314_v38 = vld [vmem:[%s3783_s1 + $0x18] sm:$0xf]  ;;  %v925_v44 = vld [vmem:[%s2938_s24 + $0x23] sm:$0xff]  ;;  %v926_v45 = vld [vmem:[%s2938_s24 + $0x2b] sm:$0xff] }
  0x34   : > { %v923_v39 = vld [vmem:[%s2938_s24 + $0x13] sm:$0xff]  ;;  %v924_v40 = vld [vmem:[%s2938_s24 + $0x1b] sm:$0xff]  ;;  %v1315_v41 = vpack.c.bf16 %v1314_v38, %v1314_v38  ;;  %v942_v46 = vpack.c.bf16 %v926_v45, %v925_v44  ;;  %v929_v52 = vld [vmem:[%s2938_s24 + $0x43] sm:$0xff] }
  0x35   : > { %v927_v47 = vld [vmem:[%s2938_s24 + $0x33] sm:$0xff]  ;;  %v930_v53 = vld [vmem:[%s2938_s24 + $0x4b] sm:$0xff]  ;;  %v1496_v57 = vld [vmem:[%s3783_s1 + $0x1c] sm:$0xf] }
  0x36   : > { %v757_v50 = vld [vmem:[%s2938_s24 + $0x92] sm:$0xff]  ;;  %v758_v51 = vld [vmem:[%s2938_s24 + $0x9a] sm:$0xff]  ;;  %v1497_v61 = vpack.c.bf16 %v1496_v57, %v1496_v57  ;;  %v933_v1 = vld [vmem:[%s2938_s24 + $0x63] sm:$0xff] }
  0x37   : > { %2327 = vmatmul.mubr.msk.bf16.gmra.mxu0 %vm287_vm3, %v278_v29  ;;  %2357 = vmatmul.mubr.msk.bf16.vlgmr.msra.gmra.mxu1 %vm287_vm3, %v247_v30  ;;  %v571_v29 = vld [vmem:[%s2938_s24 + $0x62] sm:$0xff]  ;;  %v572_v30 = vld [vmem:[%s2938_s24 + $0x6a] sm:$0xff]  ;;  %v931_v56 = vld [vmem:[%s2938_s24 + $0x53] sm:$0xff] }
  0x38   : > { %2330 = vmatprep.mubr.msk.bf16.mxu0 %vm2832_vm2, %v2831_v3  ;;  %2360 = vmatprep.mubr.msk.bf16.mxu1 %vm2832_vm2, %v2831_v3  ;;  %v932_v58 = vld [vmem:[%s2938_s24 + $0x5b] sm:$0xff]  ;;  %v934_v2 = vld [vmem:[%s2938_s24 + $0x6b] sm:$0xff]  ;;  %v935_v8 = vld [vmem:[%s2938_s24 + $0x73] sm:$0xff] }
  0x39   : > { %2431 = vmatpush3.bf16.msra.mxu1 %v798_v31  ;;  %v583_v31 = vpack.c.bf16 %v572_v30, %v571_v29  ;;  %v1105_v59 = vld [vmem:[%s2938_s24 + $0x14] sm:$0xff]  ;;  %v1106_v60 = vld [vmem:[%s2938_s24 + $0x1c] sm:$0xff]  ;;  %v1107_v4 = vld [vmem:[%s2938_s24 + $0x24] sm:$0xff] }
  0x3a   : > { %2506 = vmatprep.subr.bf16.mxu1 %v2831_v3  ;;  %v1108_v5 = vld [vmem:[%s2938_s24 + $0x2c] sm:$0xff]  ;;  %v936_v9 = vld [vmem:[%s2938_s24 + $0x7b] sm:$0xff]  ;;  %v937_v14 = vld [vmem:[%s2938_s24 + $0x83] sm:$0xff] }
  0x3b   : > { %v1109_v10 = vld [vmem:[%s2938_s24 + $0x34] sm:$0xff]  ;;  %v1110_v11 = vld [vmem:[%s2938_s24 + $0x3c] sm:$0xff]  ;;  %v938_v15 = vld [vmem:[%s2938_s24 + $0x8b] sm:$0xff] }
  0x3c   : > { %v1111_v16 = vld [vmem:[%s2938_s24 + $0x44] sm:$0xff]  ;;  %v1112_v17 = vld [vmem:[%s2938_s24 + $0x4c] sm:$0xff]  ;;  %v940_v21 = vld [vmem:[%s2938_s24 + $0x9b] sm:$0xff] }
  0x3d   : > { %v939_v20 = vld [vmem:[%s2938_s24 + $0x93] sm:$0xff]  ;;  %v1114_v23 = vld [vmem:[%s2938_s24 + $0x5c] sm:$0xff]  ;;  %v1115_v29 = vld [vmem:[%s2938_s24 + $0x64] sm:$0xff] }
  0x3e   : > { %v1113_v22 = vld [vmem:[%s2938_s24 + $0x54] sm:$0xff]  ;;  %v1116_v30 = vld [vmem:[%s2938_s24 + $0x6c] sm:$0xff] }
  0x3f   : > { %2331 = vmatmul.mubr.msk.bf16.gmra.mxu0 %vm287_vm3, %v279_v36  ;;  %2361 = vmatmul.mubr.msk.bf16.gmra.mxu1 %vm287_vm3, %v248_v37  ;;  %v576_v36 = vld [vmem:[%s2938_s24 + $0x8a] sm:$0xff] }
  0x40   : > { %2334 = vmatprep.mubr.msk.bf16.mxu0 %vm2832_vm2, %v2831_v3  ;;  %2364 = vmatprep.mubr.msk.bf16.mxu1 %vm2832_vm2, %v2831_v3  ;;  %v585_v37 = vpack.c.bf16 %v576_v36, %v575_v35  ;;  %v3240_v36 = vpack.c.bf16 %v1116_v30, %v1115_v29 }
  0x47   : > { %2335 = vmatmul.mubr.msk.bf16.gmra.mxu0 %vm287_vm3, %v280_v42  ;;  %2365 = vmatmul.mubr.msk.bf16.gmra.mxu1 %vm287_vm3, %v249_v43  ;;  %v941_v42 = vpack.c.bf16 %v924_v40, %v923_v39  ;;  %v1344_v43 = vsel %vm315_vm1, %v1315_v41, 0 }
  0x48   : > { %2338 = vmatprep.mubr.msk.bf16.mxu0 %vm2832_vm2, %v2831_v3  ;;  %2368 = vmatprep.mubr.msk.bf16.mxu1 %vm2832_vm2, %v2831_v3 }
  0x4f   : > { %2339 = vmatmul.mubr.msk.bf16.gmra.mxu0 %vm287_vm3, %v281_v48  ;;  %2369 = vmatmul.mubr.msk.bf16.gmra.mxu1 %vm287_vm3, %v250_v49  ;;  %v928_v48 = vld [vmem:[%s2938_s24 + $0x3b] sm:$0xff] }
  0x50   : > { %2342 = vmatprep.mubr.msk.bf16.mxu0 %vm2832_vm2, %v2831_v3  ;;  %2372 = vmatprep.mubr.msk.bf16.mxu1 %vm2832_vm2, %v2831_v3  ;;  %v943_v49 = vpack.c.bf16 %v928_v48, %v927_v47 }
  0x57   : > { %2343 = vmatmul.mubr.msk.bf16.gmra.mxu0 %vm287_vm3, %v282_v54  ;;  %2373 = vmatmul.mubr.msk.bf16.gmra.mxu1 %vm287_vm3, %v251_v55  ;;  %v767_v54 = vpack.c.bf16 %v758_v51, %v757_v50  ;;  %v944_v55 = vpack.c.bf16 %v930_v53, %v929_v52 }
  0x58   : > { %2376 = vmatprep.mubr.msk.bf16.mxu1 %vm2832_vm2, %v2831_v3  ;;  %2394 = vmatprep.mubr.msk.bf16.mxu0 %vm2832_vm2, %v2831_v3 }
  0x5f   : > { %2377 = vmatmul.mubr.msk.bf16.gmra.mxu1 %vm287_vm3, %v252_v62  ;;  %2395 = vmatmul.mubr.msk.bf16.vlgmr.msra.gmra.mxu0 %vm287_vm3, %v577_v63  ;;  %v945_v62 = vpack.c.bf16 %v932_v58, %v931_v56  ;;  %v1123_v63 = vpack.c.bf16 %v1106_v60, %v1105_v59 }
  0x60   : > { %2380 = vmatprep.mubr.msk.bf16.mxu1 %vm2832_vm2, %v2831_v3  ;;  %2398 = vmatprep.mubr.msk.bf16.mxu0 %vm2832_vm2, %v2831_v3 }
  0x61   : > { %2469 = vmatpush3.bf16.msra.mxu0 %v980_v0  ;;  %v1526_v0 = vsel %vm315_vm1, %v1497_v61, 0 }
  0x62   : > { %2544 = vmatprep.subr.bf16.mxu0 %v2831_v3 }
  0x67   : > { %2381 = vmatmul.mubr.msk.bf16.gmra.mxu1 %vm287_vm3, %v253_v6  ;;  %2399 = vmatmul.mubr.msk.bf16.gmra.mxu0 %vm287_vm3, %v578_v7  ;;  %v946_v6 = vpack.c.bf16 %v934_v2, %v933_v1 }
  0x68   : > { %2384 = vmatprep.mubr.msk.bf16.mxu1 %vm2832_vm2, %v2831_v3  ;;  %2402 = vmatprep.mubr.msk.bf16.mxu0 %vm2832_vm2, %v2831_v3 }
  0x6f   : > { %2385 = vmatmul.mubr.msk.bf16.gmra.mxu1 %vm287_vm3, %v254_v12  ;;  %2403 = vmatmul.mubr.msk.bf16.gmra.mxu0 %vm287_vm3, %v579_v13  ;;  %v947_v12 = vpack.c.bf16 %v936_v9, %v935_v8 }
  0x70   : > { %2388 = vmatprep.mubr.msk.bf16.mxu1 %vm2832_vm2, %v2831_v3  ;;  %2406 = vmatprep.mubr.msk.bf16.mxu0 %vm2832_vm2, %v2831_v3 }
  0x77   : > { %2389 = vmatmul.mubr.msk.bf16.gmra.mxu1 %vm287_vm3, %v255_v18  ;;  %2407 = vmatmul.mubr.msk.bf16.gmra.mxu0 %vm287_vm3, %v580_v19  ;;  %v948_v18 = vpack.c.bf16 %v938_v15, %v937_v14 }
  0x78   : > { %2410 = vmatprep.mubr.msk.bf16.mxu0 %vm2832_vm2, %v2831_v3  ;;  %2432 = vmatprep.mubr.msk.bf16.mxu1 %vm2832_vm2, %v2831_v3 }
  0x7f   : > { %2411 = vmatmul.mubr.msk.bf16.gmra.mxu0 %vm287_vm3, %v581_v24  ;;  %2433 = vmatmul.mubr.msk.bf16.vlgmr.msra.gmra.mxu1 %vm287_vm3, %v578_v7  ;;  %v1124_v7 = vpack.c.bf16 %v1108_v5, %v1107_v4  ;;  %v1121_v4 = vld [vmem:[%s2938_s24 + $0x94] sm:$0xff]  ;;  %v1122_v5 = vld [vmem:[%s2938_s24 + $0x9c] sm:$0xff] }
  0x80   : > { %2414 = vmatprep.mubr.msk.bf16.mxu0 %vm2832_vm2, %v2831_v3  ;;  %2436 = vmatprep.mubr.msk.bf16.mxu1 %vm2832_vm2, %v2831_v3 }
  0x81   : > { %2507 = vmatpush3.bf16.msra.mxu1 %v1162_v25  ;;  %v3222_v25 = vpack.c.bf16 %v1114_v23, %v1113_v22 }
  0x82   : > { %2582 = vmatprep.subr.bf16.mxu1 %v2831_v3 }
  0x87   : > { %2415 = vmatmul.mubr.msk.bf16.gmra.mxu0 %vm287_vm3, %v582_v28  ;;  %2437 = vmatmul.mubr.msk.bf16.gmra.mxu1 %vm287_vm3, %v579_v13  ;;  %v1125_v13 = vpack.c.bf16 %v1110_v11, %v1109_v10  ;;  %v3285_v10 = vpack.c.bf16 %v1122_v5, %v1121_v4 }
  0x88   : > { %2418 = vmatprep.mubr.msk.bf16.mxu0 %vm2832_vm2, %v2831_v3  ;;  %2440 = vmatprep.mubr.msk.bf16.mxu1 %vm2832_vm2, %v2831_v3 }
  0x8f   : > { %2419 = vmatmul.mubr.msk.bf16.gmra.mxu0 %vm287_vm3, %v583_v31  ;;  %2441 = vmatmul.mubr.msk.bf16.gmra.mxu1 %vm287_vm3, %v580_v19  ;;  %v3209_v19 = vpack.c.bf16 %v1112_v17, %v1111_v16  ;;  %v1469_v17 = vld [vmem:[%s2938_s24 + $0x25] sm:$0xff] }
  0x90   : > { %2422 = vmatprep.mubr.msk.bf16.mxu0 %vm2832_vm2, %v2831_v3  ;;  %2444 = vmatprep.mubr.msk.bf16.mxu1 %vm2832_vm2, %v2831_v3 }
  0x97   : > { %2423 = vmatmul.mubr.msk.bf16.gmra.mxu0 %vm287_vm3, %v584_v34  ;;  %2445 = vmatmul.mubr.msk.bf16.gmra.mxu1 %vm287_vm3, %v581_v24  ;;  %v949_v24 = vpack.c.bf16 %v940_v21, %v939_v20 }
  0x98   : > { %2426 = vmatprep.mubr.msk.bf16.mxu0 %vm2832_vm2, %v2831_v3  ;;  %2448 = vmatprep.mubr.msk.bf16.mxu1 %vm2832_vm2, %v2831_v3 }
  0x9f   : > { %2427 = vmatmul.mubr.msk.bf16.gmra.mxu0 %vm287_vm3, %v585_v37  ;;  %2449 = vmatmul.mubr.msk.bf16.gmra.mxu1 %vm287_vm3, %v582_v28  ;;  %v1678_v28 = vld [vmem:[%s3783_s1 + $0x20] sm:$0xf] }
  0xa0   : > { %2452 = vmatprep.mubr.msk.bf16.mxu1 %vm2832_vm2, %v2831_v3  ;;  %2470 = vmatprep.mubr.msk.bf16.mxu0 %vm2832_vm2, %v2831_v3  ;;  %v1679_v33 = vpack.c.bf16 %v1678_v28, %v1678_v28 }
  0xa2   : > { %v1708_v39 = vsel %vm315_vm1, %v1679_v33, 0 }
  0xa7   : > { %2453 = vmatmul.mubr.msk.bf16.gmra.mxu1 %vm287_vm3, %v583_v31  ;;  %2471 = vmatmul.mubr.msk.bf16.vlgmr.msra.gmra.mxu0 %vm287_vm3, %v941_v42  ;;  %v1117_v42 = vld [vmem:[%s2938_s24 + $0x74] sm:$0xff] }
  0xa8   : > { %2456 = vmatprep.mubr.msk.bf16.mxu1 %vm2832_vm2, %v2831_v3  ;;  %2474 = vmatprep.mubr.msk.bf16.mxu0 %vm2832_vm2, %v2831_v3 }
  0xa9   : > { %2545 = vmatpush3.bf16.msra.mxu0 %v1344_v43  ;;  %v1118_v43 = vld [vmem:[%s2938_s24 + $0x7c] sm:$0xff] }
  0xaa   : > { %2620 = vmatprep.subr.bf16.mxu0 %v2831_v3  ;;  %v3256_v48 = vpack.c.bf16 %v1118_v43, %v1117_v42 }
  0xaf   : > { %2457 = vmatmul.mubr.msk.bf16.gmra.mxu1 %vm287_vm3, %v584_v34  ;;  %2475 = vmatmul.mubr.msk.bf16.gmra.mxu0 %vm287_vm3, %v942_v46 }
  0xb0   : > { %2460 = vmatprep.mubr.msk.bf16.mxu1 %vm2832_vm2, %v2831_v3  ;;  %2478 = vmatprep.mubr.msk.bf16.mxu0 %vm2832_vm2, %v2831_v3 }
  0xb7   : > { %2461 = vmatmul.mubr.msk.bf16.gmra.mxu1 %vm287_vm3, %v585_v37  ;;  %2479 = vmatmul.mubr.msk.bf16.gmra.mxu0 %vm287_vm3, %v943_v49 }
  0xb8   : > { %2464 = vmatprep.mubr.msk.bf16.mxu1 %vm2832_vm2, %v2831_v3  ;;  %2482 = vmatprep.mubr.msk.bf16.mxu0 %vm2832_vm2, %v2831_v3 }
  0xbf   : > { %2465 = vmatmul.mubr.msk.bf16.gmra.mxu1 %vm287_vm3, %v767_v54  ;;  %2483 = vmatmul.mubr.msk.bf16.gmra.mxu0 %vm287_vm3, %v944_v55  ;;  %v1119_v54 = vld [vmem:[%s2938_s24 + $0x84] sm:$0xff]  ;;  %v1120_v55 = vld [vmem:[%s2938_s24 + $0x8c] sm:$0xff] }
  0xc0   : > { %2486 = vmatprep.mubr.msk.bf16.mxu0 %vm2832_vm2, %v2831_v3  ;;  %2508 = vmatprep.mubr.msk.bf16.mxu1 %vm2832_vm2, %v2831_v3  ;;  %v3269_v60 = vpack.c.bf16 %v1120_v55, %v1119_v54 }
  0xc7   : > { %2487 = vmatmul.mubr.msk.bf16.gmra.mxu0 %vm287_vm3, %v945_v62  ;;  %2509 = vmatmul.mubr.msk.bf16.vlgmr.msra.gmra.mxu1 %vm287_vm3, %v1123_v63 }
  0xc8   : > { %2490 = vmatprep.mubr.msk.bf16.mxu0 %vm2832_vm2, %v2831_v3  ;;  %2512 = vmatprep.mubr.msk.bf16.mxu1 %vm2832_vm2, %v2831_v3 }
  0xc9   : > { %2583 = vmatpush3.bf16.msra.mxu1 %v1526_v0 }
  0xca   : > { %1872 = vmatprep.subr.mxu1 %v2831_v3 }
  0xcf   : > { %2491 = vmatmul.mubr.msk.bf16.gmra.mxu0 %vm287_vm3, %v946_v6  ;;  %2513 = vmatmul.mubr.msk.bf16.gmra.mxu1 %vm287_vm3, %v1124_v7 }
  0xd0   : > { %2494 = vmatprep.mubr.msk.bf16.mxu0 %vm2832_vm2, %v2831_v3  ;;  %2516 = vmatprep.mubr.msk.bf16.mxu1 %vm2832_vm2, %v2831_v3 }
  0xd7   : > { %2495 = vmatmul.mubr.msk.bf16.gmra.mxu0 %vm287_vm3, %v947_v12  ;;  %2517 = vmatmul.mubr.msk.bf16.gmra.mxu1 %vm287_vm3, %v1125_v13 }
  0xd8   : > { %2498 = vmatprep.mubr.msk.bf16.mxu0 %vm2832_vm2, %v2831_v3  ;;  %2520 = vmatprep.mubr.msk.bf16.mxu1 %vm2832_vm2, %v2831_v3 }
  0xdf   : > { %2499 = vmatmul.mubr.msk.bf16.gmra.mxu0 %vm287_vm3, %v948_v18  ;;  %2521 = vmatmul.mubr.msk.bf16.gmra.mxu1 %vm287_vm3, %v3209_v19  ;;  %v1470_v18 = vld [vmem:[%s2938_s24 + $0x2d] sm:$0xff] }
  0xe0   : > { %2502 = vmatprep.mubr.msk.bf16.mxu0 %vm2832_vm2, %v2831_v3  ;;  %2524 = vmatprep.mubr.msk.bf16.mxu1 %vm2832_vm2, %v2831_v3  ;;  %v1487_v23 = vpack.c.bf16 %v1470_v18, %v1469_v17 }
  0xe7   : > { %v353_v26 = vpop.f32.mrf.mxu0  ;;  %v3224_v27 = vpop.f32.mrf.mxu1  ;;  %2503 = vmatmul.mubr.msk.bf16.gmra.mxu0 %vm287_vm3, %v949_v24  ;;  %2525 = vmatmul.mubr.msk.bf16.gmra.mxu1 %vm287_vm3, %v3222_v25 }
  0xe8   : > { %2528 = vmatprep.mubr.msk.bf16.mxu1 %vm2832_vm2, %v2831_v3  ;;  %2546 = vmatprep.mubr.msk.bf16.mxu0 %vm2832_vm2, %v2831_v3 }
  0xe9   : > { %v2320_v31 = vpop.f32.mrf.mxu0  ;;  %v2348_v32 = vpop.f32.mrf.mxu1 }
  0xea   : > { %v1471_v31 = vld [vmem:[%s2938_s24 + $0x35] sm:$0xff]  ;;  %v1472_v32 = vld [vmem:[%s2938_s24 + $0x3d] sm:$0xff] }
  0xeb   : > { %v356_v34 = vpop.f32.mrf.mxu0  ;;  %v3238_v35 = vpop.f32.mrf.mxu1 }
  0xed   : > { %v2321_v37 = vpop.f32.mrf.mxu0  ;;  %v2349_v38 = vpop.f32.mrf.mxu1 }
  0xef   : > { %v361_v40 = vpop.f32.mrf.mxu0  ;;  %v3243_v41 = vpop.f32.mrf.mxu1  ;;  %2529 = vmatmul.mubr.msk.bf16.gmra.mxu1 %vm287_vm3, %v3240_v36  ;;  %2547 = vmatmul.mubr.msk.bf16.vlgmr.msra.gmra.mxu0 %vm287_vm3, %v1124_v7 }
  0xf0   : > { %2532 = vmatprep.mubr.msk.bf16.mxu1 %vm2832_vm2, %v2831_v3  ;;  %2550 = vmatprep.mubr.msk.bf16.mxu0 %vm2832_vm2, %v2831_v3 }
  0xf1   : > { %v2324_v44 = vpop.f32.mrf.mxu0  ;;  %v2352_v45 = vpop.f32.mrf.mxu1  ;;  %2621 = vmatpush3.bf16.msra.mxu0 %v1708_v39  ;;  %v1488_v39 = vpack.c.bf16 %v1472_v32, %v1471_v31 }
  0xf3   : > { %v364_v46 = vpop.f32.mrf.mxu0  ;;  %v3254_v47 = vpop.f32.mrf.mxu1 }
  0xf5   : > { %v2325_v49 = vpop.f32.mrf.mxu0  ;;  %v2353_v50 = vpop.f32.mrf.mxu1 }
  0xf6   : > { %v1474_v49 = vld [vmem:[%s2938_s24 + $0x4d] sm:$0xff] }
  0xf7   : > { %v369_v51 = vpop.f32.mrf.mxu0  ;;  %v488_v52 = vpop.f32.mrf.mxu1  ;;  %2533 = vmatmul.mubr.msk.bf16.gmra.mxu1 %vm287_vm3, %v3256_v48  ;;  %2551 = vmatmul.mubr.msk.bf16.gmra.mxu0 %vm287_vm3, %v1125_v13 }
  0xf8   : > { %v3261_v53 = vadd.f32 %v488_v52, %v353_v26  ;;  %2536 = vmatprep.mubr.msk.bf16.mxu1 %vm2832_vm2, %v2831_v3  ;;  %2554 = vmatprep.mubr.msk.bf16.mxu0 %vm2832_vm2, %v2831_v3 }
  0xf9   : > { %v2328_v56 = vpop.f32.mrf.mxu0  ;;  %v2358_v57 = vpop.f32.mrf.mxu1 }
  0xfb   : > { %v372_v58 = vpop.f32.mrf.mxu0  ;;  %v491_v59 = vpop.f32.mrf.mxu1 }
  0xfc   : > { %v3271_v61 = vadd.f32 %v491_v59, %v356_v34 }
  0xfd   : > { %v2329_v62 = vpop.f32.mrf.mxu0  ;;  %v2359_v63 = vpop.f32.mrf.mxu1 }
  0xff   : > { %v377_v0 = vpop.f32.mrf.mxu0  ;;  %v496_v1 = vpop.f32.mrf.mxu1  ;;  %2537 = vmatmul.mubr.msk.bf16.gmra.mxu1 %vm287_vm3, %v3269_v60  ;;  %2555 = vmatmul.mubr.msk.bf16.gmra.mxu0 %vm287_vm3, %v3209_v19 }
 0x100   : > { %v3277_v2 = vadd.f32 %v496_v1, %v361_v40  ;;  %2540 = vmatprep.mubr.msk.bf16.mxu1 %vm2832_vm2, %v2831_v3  ;;  %2558 = vmatprep.mubr.msk.bf16.mxu0 %vm2832_vm2, %v2831_v3  ;;  %v1476_v1 = vld [vmem:[%s2938_s24 + $0x5d] sm:$0xff] }
 0x101   : > { %v2332_v6 = vpop.f32.mrf.mxu0  ;;  %v2362_v7 = vpop.f32.mrf.mxu1 }
 0x103   : > { %v380_v8 = vpop.f32.mrf.mxu0  ;;  %v499_v9 = vpop.f32.mrf.mxu1 }
 0x104   : > { %v3287_v11 = vadd.f32 %v499_v9, %v364_v46  ;;  %v1473_v46 = vld [vmem:[%s2938_s24 + $0x45] sm:$0xff] }
 0x105   : > { %v2333_v12 = vpop.f32.mrf.mxu0  ;;  %v2363_v13 = vpop.f32.mrf.mxu1  ;;  %v1489_v55 = vpack.c.bf16 %v1474_v49, %v1473_v46 }
 0x107   : > { %v385_v14 = vpop.f32.mrf.mxu0  ;;  %v504_v15 = vpop.f32.mrf.mxu1  ;;  %2541 = vmatmul.mubr.msk.bf16.gmra.mxu1 %vm287_vm3, %v3285_v10  ;;  %2559 = vmatmul.mubr.msk.bf16.gmra.mxu0 %vm287_vm3, %v3222_v25 }
 0x108   : > { %v3293_v16 = vadd.f32 %v504_v15, %v369_v51  ;;  %2562 = vmatprep.mubr.msk.bf16.mxu0 %vm2832_vm2, %v2831_v3  ;;  %2584 = vmatprep.mubr.msk.bf16.mxu1 %vm2832_vm2, %v2831_v3  ;;  %v1303_v15 = vld [vmem:[%s2938_s24 + $0xa4] sm:$0xff] }
 0x109   : > { %v2336_v19 = vpop.f32.mrf.mxu0  ;;  %v2366_v20 = vpop.f32.mrf.mxu1 }
 0x10a   : > { %v1477_v19 = vld [vmem:[%s2938_s24 + $0x65] sm:$0xff]  ;;  %v1478_v20 = vld [vmem:[%s2938_s24 + $0x6d] sm:$0xff] }
 0x10b   : > { %v388_v21 = vpop.f32.mrf.mxu0  ;;  %v507_v22 = vpop.f32.mrf.mxu1 }
 0x10c   : > { %v3301_v24 = vadd.f32 %v507_v22, %v372_v58 }
 0x10d   : > { %v2337_v25 = vpop.f32.mrf.mxu0  ;;  %v2367_v26 = vpop.f32.mrf.mxu1 }
 0x10f   : > { %v393_v28 = vpop.f32.mrf.mxu0  ;;  %v512_v29 = vpop.f32.mrf.mxu1  ;;  %2563 = vmatmul.mubr.msk.bf16.gmra.mxu0 %vm287_vm3, %v3240_v36  ;;  %2585 = vmatmul.mubr.msk.bf16.vlgmr.msra.gmra.mxu1 %vm287_vm3, %v1487_v23 }
 0x110   : > { %v3306_v30 = vadd.f32 %v512_v29, %v377_v0  ;;  %2566 = vmatprep.mubr.msk.bf16.mxu0 %vm2832_vm2, %v2831_v3  ;;  %2588 = vmatprep.mubr.msk.bf16.mxu1 %vm2832_vm2, %v2831_v3  ;;  %v1475_v0 = vld [vmem:[%s2938_s24 + $0x55] sm:$0xff] }
 0x111   : > { %v2340_v33 = vpop.f32.mrf.mxu0  ;;  %v2370_v34 = vpop.f32.mrf.mxu1  ;;  %v1490_v7 = vpack.c.bf16 %v1476_v1, %v1475_v0 }
 0x112   : > { %v1479_v34 = vld [vmem:[%s2938_s24 + $0x75] sm:$0xff] }
 0x113   : > { %v396_v37 = vpop.f32.mrf.mxu0  ;;  %v515_v38 = vpop.f32.mrf.mxu1 }
 0x114   : > { %v3314_v36 = vadd.f32 %v515_v38, %v380_v8  ;;  %v1651_v38 = vld [vmem:[%s2938_s24 + $0x26] sm:$0xff] }
 0x115   : > { %v2341_v40 = vpop.f32.mrf.mxu0  ;;  %v2371_v42 = vpop.f32.mrf.mxu1 }
 0x117   : > { %v401_v43 = vpop.f32.mrf.mxu0  ;;  %v520_v44 = vpop.f32.mrf.mxu1  ;;  %2567 = vmatmul.mubr.msk.bf16.gmra.mxu0 %vm287_vm3, %v3256_v48  ;;  %2589 = vmatmul.mubr.msk.bf16.gmra.mxu1 %vm287_vm3, %v1488_v39  ;;  %v1652_v39 = vld [vmem:[%s2938_s24 + $0x2e] sm:$0xff] }
 0x118   : > { %v3319_v45 = vadd.f32 %v520_v44, %v385_v14  ;;  %2570 = vmatprep.mubr.msk.bf16.mxu0 %vm2832_vm2, %v2831_v3  ;;  %2592 = vmatprep.mubr.msk.bf16.mxu1 %vm2832_vm2, %v2831_v3  ;;  %v1669_v46 = vpack.c.bf16 %v1652_v39, %v1651_v38  ;;  %v1658_v39 = vld [vmem:[%s2938_s24 + $0x5e] sm:$0xff] }
 0x119   : > { %v2344_v50 = vpop.f32.mrf.mxu0  ;;  %v2374_v51 = vpop.f32.mrf.mxu1 }
 0x11b   : > { %v404_v52 = vpop.f32.mrf.mxu0  ;;  %v523_v54 = vpop.f32.mrf.mxu1 }
 0x11c   : > { %v3327_v48 = vadd.f32 %v523_v54, %v388_v21 }
 0x11d   : > { %v2345_v56 = vpop.f32.mrf.mxu0  ;;  %v2375_v57 = vpop.f32.mrf.mxu1 }
 0x11e   : > { %v1653_v57 = vld [vmem:[%s2938_s24 + $0x36] sm:$0xff] }
 0x11f   : > { %v528_v58 = vpop.f32.mrf.mxu1  ;;  %v652_v59 = vpop.f32.mrf.mxu0  ;;  %2571 = vmatmul.mubr.msk.bf16.gmra.mxu0 %vm287_vm3, %v3269_v60  ;;  %2593 = vmatmul.mubr.msk.bf16.gmra.mxu1 %vm287_vm3, %v1489_v55  ;;  %v1481_v55 = vld [vmem:[%s2938_s24 + $0x85] sm:$0xff] }
 0x120   : > { %v3332_v62 = vadd.f32 %v528_v58, %v393_v28  ;;  %v3335_v63 = vadd.f32 %v652_v59, %v3261_v53  ;;  %2574 = vmatprep.mubr.msk.bf16.mxu0 %vm2832_vm2, %v2831_v3  ;;  %2596 = vmatprep.mubr.msk.bf16.mxu1 %vm2832_vm2, %v2831_v3  ;;  %v1654_v58 = vld [vmem:[%s2938_s24 + $0x3e] sm:$0xff] }
 0x121   : > { %v2378_v4 = vpop.f32.mrf.mxu1  ;;  %v2396_v5 = vpop.f32.mrf.mxu0 }
 0x123   : > { %v531_v6 = vpop.f32.mrf.mxu1  ;;  %v655_v60 = vpop.f32.mrf.mxu0 }
 0x124   : > { %v3343_v8 = vadd.f32 %v531_v6, %v396_v37  ;;  %v3346_v53 = vadd.f32 %v655_v60, %v3271_v61  ;;  %v1304_v61 = vld [vmem:[%s2938_s24 + $0xac] sm:$0xff] }
 0x125   : > { %v2379_v9 = vpop.f32.mrf.mxu1  ;;  %v2397_v12 = vpop.f32.mrf.mxu0  ;;  %v1313_v25 = vpack.c.bf16 %v1304_v61, %v1303_v15  ;;  %v1655_v61 = vld [vmem:[%s2938_s24 + $0x46] sm:$0xff] }
 0x127   : > { %v536_v13 = vpop.f32.mrf.mxu1  ;;  %v660_v14 = vpop.f32.mrf.mxu0  ;;  %2575 = vmatmul.mubr.msk.bf16.gmra.mxu0 %vm287_vm3, %v3285_v10  ;;  %2597 = vmatmul.mubr.msk.bf16.gmra.mxu1 %vm287_vm3, %v1490_v7 }
 0x128   : > { %v3352_v17 = vadd.f32 %v536_v13, %v401_v43  ;;  %v3355_v18 = vadd.f32 %v660_v14, %v3277_v2  ;;  %2578 = vmatprep.mubr.msk.bf16.mxu0 %vm2832_vm2, %v2831_v3  ;;  %2600 = vmatprep.mubr.msk.bf16.mxu1 %vm2832_vm2, %v2831_v3  ;;  %v1491_v2 = vpack.c.bf16 %v1478_v20, %v1477_v19  ;;  %v1483_v13 = vld [vmem:[%s2938_s24 + $0x95] sm:$0xff] }
 0x129   : > { %v2382_v21 = vpop.f32.mrf.mxu1  ;;  %v2400_v10 = vpop.f32.mrf.mxu0  ;;  %v1656_v19 = vld [vmem:[%s2938_s24 + $0x4e] sm:$0xff] }
 0x12b   : > { %v539_v22 = vpop.f32.mrf.mxu1  ;;  %v663_v23 = vpop.f32.mrf.mxu0 }
 0x12c   : > { %v3364_v26 = vadd.f32 %v539_v22, %v404_v52  ;;  %v3367_v28 = vadd.f32 %v663_v23, %v3287_v11  ;;  %v1480_v11 = vld [vmem:[%s2938_s24 + $0x7d] sm:$0xff]  ;;  %v1671_v23 = vpack.c.bf16 %v1656_v19, %v1655_v61 }
 0x12d   : > { %v2383_v29 = vpop.f32.mrf.mxu1  ;;  %v2401_v31 = vpop.f32.mrf.mxu0 }
 0x12f   : > { %v3369_v32 = vpop.f32.mrf.mxu1  ;;  %v668_v33 = vpop.f32.mrf.mxu0  ;;  %2579 = vmatmul.mubr.msk.bf16.gmra.mxu0 %vm287_vm3, %v1313_v25  ;;  %2601 = vmatmul.mubr.msk.bf16.gmra.mxu1 %vm287_vm3, %v1491_v2 }
 0x130   : > { %v3375_v37 = vadd.f32 %v668_v33, %v3293_v16  ;;  %2604 = vmatprep.mubr.msk.bf16.mxu1 %vm2832_vm2, %v2831_v3  ;;  %2622 = vmatprep.mubr.msk.bf16.mxu0 %vm2832_vm2, %v2831_v3  ;;  %v1492_v16 = vpack.c.bf16 %v1480_v11, %v1479_v34  ;;  %v1485_v34 = vld [vmem:[%s2938_s24 + $0xa5] sm:$0xff] }
 0x131   : > { %v2386_v40 = vpop.f32.mrf.mxu1  ;;  %v2404_v42 = vpop.f32.mrf.mxu0 }
 0x133   : > { %v3384_v43 = vpop.f32.mrf.mxu1  ;;  %v671_v44 = vpop.f32.mrf.mxu0 }
 0x134   : > { %v3387_v49 = vadd.f32 %v671_v44, %v3301_v24  ;;  %v1482_v24 = vld [vmem:[%s2938_s24 + $0x8d] sm:$0xff] }
 0x135   : > { %v2387_v50 = vpop.f32.mrf.mxu1  ;;  %v2405_v51 = vpop.f32.mrf.mxu0  ;;  %v1493_v5 = vpack.c.bf16 %v1482_v24, %v1481_v55 }
 0x137   : > { %v3389_v52 = vpop.f32.mrf.mxu1  ;;  %v676_v54 = vpop.f32.mrf.mxu0  ;;  %2605 = vmatmul.mubr.msk.bf16.gmra.mxu1 %vm287_vm3, %v1492_v16  ;;  %2623 = vmatmul.mubr.msk.bf16.vlgmr.msra.gmra.mxu0 %vm287_vm3, %v1669_v46 }
 0x138   : > { %v3395_v56 = vadd.f32 %v676_v54, %v3306_v30  ;;  %2608 = vmatprep.mubr.msk.bf16.mxu1 %vm2832_vm2, %v2831_v3  ;;  %2626 = vmatprep.mubr.msk.bf16.mxu0 %vm2832_vm2, %v2831_v3  ;;  %v1670_v30 = vpack.c.bf16 %v1654_v58, %v1653_v57 }
 0x139   : > { %v2390_v59 = vpop.f32.mrf.mxu1  ;;  %v2408_v0 = vpop.f32.mrf.mxu0 }
 0x13b   : > { %v3404_v1 = vpop.f32.mrf.mxu1  ;;  %v679_v4 = vpop.f32.mrf.mxu0 }
 0x13c   : > { %v3407_v6 = vadd.f32 %v679_v4, %v3314_v36  ;;  %v1484_v36 = vld [vmem:[%s2938_s24 + $0x9d] sm:$0xff] }
 0x13d   : > { %v2391_v60 = vpop.f32.mrf.mxu1  ;;  %v2409_v7 = vpop.f32.mrf.mxu0 }
 0x13f   : > { %v684_v9 = vpop.f32.mrf.mxu0  ;;  %v834_v12 = vpop.f32.mrf.mxu1  ;;  %2609 = vmatmul.mubr.msk.bf16.gmra.mxu1 %vm287_vm3, %v1493_v5  ;;  %2627 = vmatmul.mubr.msk.bf16.gmra.mxu0 %vm287_vm3, %v1670_v30 }
 0x140   : > { %v3413_v14 = vadd.f32 %v684_v9, %v3319_v45  ;;  %v3416_v15 = vadd.f32 %v834_v12, %v3335_v63  ;;  %2612 = vmatprep.mubr.msk.bf16.mxu1 %vm2832_vm2, %v2831_v3  ;;  %2630 = vmatprep.mubr.msk.bf16.mxu0 %vm2832_vm2, %v2831_v3  ;;  %v1494_v45 = vpack.c.bf16 %v1484_v36, %v1483_v13 }
 0x141   : > { %v2412_v20 = vpop.f32.mrf.mxu0  ;;  %v2434_v21 = vpop.f32.mrf.mxu1  ;;  %v545_v9 = vadd.f32 %v3369_v32, %v3224_v27  ;;  %v548_v27 = vadd.f32 %v3384_v43, %v3238_v35  ;;  %v1663_v43 = vld [vmem:[%s2938_s24 + $0x86] sm:$0xff] }
 0x143   : > { %v687_v10 = vpop.f32.mrf.mxu0  ;;  %v837_v22 = vpop.f32.mrf.mxu1 }
 0x144   : > { %v3426_v63 = vadd.f32 %v687_v10, %v3327_v48  ;;  %v3429_v25 = vadd.f32 %v837_v22, %v3346_v53  ;;  %v1486_v48 = vld [vmem:[%s2938_s24 + $0xad] sm:$0xff]  ;;  %v1657_v53 = vld [vmem:[%s2938_s24 + $0x56] sm:$0xff] }
 0x145   : > { %v2413_v2 = vpop.f32.mrf.mxu0  ;;  %v2435_v29 = vpop.f32.mrf.mxu1  ;;  %v1672_v46 = vpack.c.bf16 %v1658_v39, %v1657_v53 }
 0x146   : > { %v553_v2 = vadd.f32 %v3389_v52, %v3243_v41  ;;  %v556_v41 = vadd.f32 %v3404_v1, %v3254_v47  ;;  %v1665_v47 = vld [vmem:[%s2938_s24 + $0x96] sm:$0xff]  ;;  %v1666_v1 = vld [vmem:[%s2938_s24 + $0x9e] sm:$0xff] }
 0x147   : > { %v692_v31 = vpop.f32.mrf.mxu0  ;;  %v842_v33 = vpop.f32.mrf.mxu1  ;;  %2613 = vmatmul.mubr.msk.bf16.gmra.mxu1 %vm287_vm3, %v1494_v45  ;;  %2631 = vmatmul.mubr.msk.bf16.gmra.mxu0 %vm287_vm3, %v1671_v23 }
 0x148   : > { %v3435_v11 = vadd.f32 %v692_v31, %v3332_v62  ;;  %v3438_v38 = vadd.f32 %v842_v33, %v3355_v18  ;;  %2616 = vmatprep.mubr.msk.bf16.mxu1 %vm2832_vm2, %v2831_v3  ;;  %2634 = vmatprep.mubr.msk.bf16.mxu0 %vm2832_vm2, %v2831_v3  ;;  %v1495_v62 = vpack.c.bf16 %v1486_v48, %v1485_v34 }
 0x149   : > { %v2416_v40 = vpop.f32.mrf.mxu0  ;;  %v2438_v42 = vpop.f32.mrf.mxu1 }
 0x14b   : > { %v695_v44 = vpop.f32.mrf.mxu0  ;;  %v845_v16 = vpop.f32.mrf.mxu1 }
 0x14c   : > { %v3448_v18 = vadd.f32 %v695_v44, %v3343_v8  ;;  %v3451_v50 = vadd.f32 %v845_v16, %v3367_v28  ;;  %v1659_v8 = vld [vmem:[%s2938_s24 + $0x66] sm:$0xff]  ;;  %v1660_v28 = vld [vmem:[%s2938_s24 + $0x6e] sm:$0xff] }
 0x14d   : > { %v2417_v51 = vpop.f32.mrf.mxu0  ;;  %v2439_v54 = vpop.f32.mrf.mxu1  ;;  %v1673_v30 = vpack.c.bf16 %v1660_v28, %v1659_v8  ;;  %v1676_v8 = vpack.c.bf16 %v1666_v1, %v1665_v47 }
 0x14f   : > { %v700_v55 = vpop.f32.mrf.mxu0  ;;  %v850_v24 = vpop.f32.mrf.mxu1  ;;  %2617 = vmatmul.mubr.msk.bf16.gmra.mxu1 %vm287_vm3, %v1495_v62  ;;  %2635 = vmatmul.mubr.msk.bf16.gmra.mxu0 %vm287_vm3, %v1672_v46 }
 0x150   : > { %v3456_v57 = vadd.f32 %v700_v55, %v3352_v17  ;;  %v3459_v58 = vadd.f32 %v850_v24, %v3375_v37  ;;  %2638 = vmatprep.mubr.msk.bf16.mxu0 %vm2832_vm2, %v2831_v3 }
 0x151   : > { %v2420_v59 = vpop.f32.mrf.mxu0  ;;  %v2442_v0 = vpop.f32.mrf.mxu1 }
 0x153   : > { %v703_v4 = vpop.f32.mrf.mxu0  ;;  %v853_v5 = vpop.f32.mrf.mxu1 }
 0x154   : > { %v3466_v60 = vadd.f32 %v703_v4, %v3364_v26  ;;  %v3469_v17 = vadd.f32 %v853_v5, %v3387_v49  ;;  %v1661_v26 = vld [vmem:[%s2938_s24 + $0x76] sm:$0xff]  ;;  %v1662_v49 = vld [vmem:[%s2938_s24 + $0x7e] sm:$0xff] }
 0x155   : > { %v2421_v37 = vpop.f32.mrf.mxu0  ;;  %v2443_v7 = vpop.f32.mrf.mxu1  ;;  %v1674_v10 = vpack.c.bf16 %v1662_v49, %v1661_v26 }
 0x156   : > { %v1667_v37 = vld [vmem:[%s2938_s24 + $0xa6] sm:$0xff]  ;;  %v1668_v7 = vld [vmem:[%s2938_s24 + $0xae] sm:$0xff] }
 0x157   : > { %v708_v12 = vpop.f32.mrf.mxu0  ;;  %v858_v13 = vpop.f32.mrf.mxu1  ;;  %2639 = vmatmul.mubr.msk.bf16.gmra.mxu0 %vm287_vm3, %v1673_v30 }
 0x158   : > { %v3474_v36 = vadd.f32 %v708_v12, %v545_v9  ;;  %v3477_v61 = vadd.f32 %v858_v13, %v3395_v56  ;;  %2642 = vmatprep.mubr.msk.bf16.mxu0 %vm2832_vm2, %v2831_v3  ;;  %v1677_v13 = vpack.c.bf16 %v1668_v7, %v1667_v37 }
 0x159   : > { %v2424_v19 = vpop.f32.mrf.mxu0  ;;  %v2446_v20 = vpop.f32.mrf.mxu1 }
 0x15b   : > { %v711_v32 = vpop.f32.mrf.mxu0  ;;  %v861_v21 = vpop.f32.mrf.mxu1 }
 0x15c   : > { %v3485_v22 = vadd.f32 %v711_v32, %v548_v27  ;;  %v3488_v56 = vadd.f32 %v861_v21, %v3407_v6  ;;  %v1664_v6 = vld [vmem:[%s2938_s24 + $0x8e] sm:$0xff]  ;;  %s2742_s24 = scalar_lea.vmem %s2741_s19, 64 }
 0x15d   : > { %v2425_v45 = vpop.f32.mrf.mxu0  ;;  %v2447_v23 = vpop.f32.mrf.mxu1  ;;  %v1675_v39 = vpack.c.bf16 %v1664_v6, %v1663_v43  ;;  %p2744_p6 = scmp.lt.s32.totalorder %s2742_s24, %s2736_s10 }
 0x15f   : > { %v716_v29 = vpop.f32.mrf.mxu0  ;;  %v866_v31 = vpop.f32.mrf.mxu1  ;;  %2643 = vmatmul.mubr.msk.bf16.gmra.mxu0 %vm287_vm3, %v1674_v10  ;;  %p2745_p7 = por %p2744_p6, %p2743_p5 }
 0x160   : > { %v3493_v33 = vadd.f32 %v716_v29, %v553_v2  ;;  %v3496_v35 = vadd.f32 %v866_v31, %v3413_v14  ;;  %2646 = vmatprep.mubr.msk.bf16.mxu0 %vm2832_vm2, %v2831_v3 }
 0x161   : > { %v2428_v34 = vpop.f32.mrf.mxu0  ;;  %v2450_v48 = vpop.f32.mrf.mxu1  ;;  %p2746_p8 = pnand %p2745_p7, %p2739_p4 }
 0x163   : > { %v719_v52 = vpop.f32.mrf.mxu0  ;;  %v869_v53 = vpop.f32.mrf.mxu1 }
 0x164   : > { %v740_v40 = vadd.f32 %v719_v52, %v556_v41  ;;  %v3505_v42 = vadd.f32 %v869_v53, %v3426_v63 }
 0x165   : > { %v2429_v14 = vpop.f32.mrf.mxu0  ;;  %v2451_v44 = vpop.f32.mrf.mxu1 }
 0x167   : > { %v874_v16 = vpop.f32.mrf.mxu1  ;;  %v1016_v62 = vpop.f32.mrf.mxu0  ;;  %2647 = vmatmul.mubr.msk.bf16.gmra.mxu0 %vm287_vm3, %v1675_v39 }
 0x168   : > { %v3509_v46 = vadd.f32 %v874_v16, %v3435_v11  ;;  %v1087_v51 = vadd.f32 %v1016_v62, %v3416_v15  ;;  %2650 = vmatprep.mubr.msk.bf16.mxu0 %vm2832_vm2, %v2831_v3 }
 0x169   : > { %v2454_v54 = vpop.f32.mrf.mxu1  ;;  %v2472_v63 = vpop.f32.mrf.mxu0 }
 0x16b   : > { %v877_v55 = vpop.f32.mrf.mxu1  ;;  %v1019_v24 = vpop.f32.mrf.mxu0 }
 0x16c   : > { %v3517_v28 = vadd.f32 %v877_v55, %v3448_v18  ;;  %v1088_v11 = vadd.f32 %v1019_v24, %v3429_v25 }
 0x16d   : > { %v2455_v59 = vpop.f32.mrf.mxu1  ;;  %v2473_v0 = vpop.f32.mrf.mxu0 }
 0x16f   : > { %v882_v15 = vpop.f32.mrf.mxu1  ;;  %v1024_v4 = vpop.f32.mrf.mxu0  ;;  %2651 = vmatmul.mubr.msk.bf16.gmra.mxu0 %vm287_vm3, %v1676_v8 }
 0x170   : > { %v3522_v5 = vadd.f32 %v882_v15, %v3456_v57  ;;  %v1089_v30 = vadd.f32 %v1024_v4, %v3438_v38  ;;  %2654 = vmatprep.mubr.msk.bf16.mxu0 %vm2832_vm2, %v2831_v3 }
 0x171   : > { %v2458_v18 = vpop.f32.mrf.mxu1  ;;  %v2476_v9 = vpop.f32.mrf.mxu0 }
 0x173   : > { %v885_v12 = vpop.f32.mrf.mxu1  ;;  %v1027_v25 = vpop.f32.mrf.mxu0 }
 0x174   : > { %v918_v26 = vadd.f32 %v885_v12, %v3466_v60  ;;  %v1090_v49 = vadd.f32 %v1027_v25, %v3451_v50 }
 0x175   : > { %v2459_v19 = vpop.f32.mrf.mxu1  ;;  %v2477_v20 = vpop.f32.mrf.mxu0 }
 0x177   : > { %v890_v57 = vpop.f32.mrf.mxu1  ;;  %v1032_v27 = vpop.f32.mrf.mxu0  ;;  %2655 = vmatmul.mubr.msk.bf16.gmra.mxu0 %vm287_vm3, %v1677_v13 }
 0x178   : > { %v919_v38 = vadd.f32 %v890_v57, %v3474_v36  ;;  %v1091_v32 = vadd.f32 %v1032_v27, %v3459_v58 }
 0x179   : > { %v2462_v21 = vpop.f32.mrf.mxu1  ;;  %v2480_v10 = vpop.f32.mrf.mxu0 }
 0x17b   : > { %v893_v45 = vpop.f32.mrf.mxu1  ;;  %v1035_v23 = vpop.f32.mrf.mxu0 }
 0x17c   : > { %v920_v2 = vadd.f32 %v893_v45, %v3485_v22  ;;  %v1092_v60 = vadd.f32 %v1035_v23, %v3469_v17 }
 0x17d   : > { %v2463_v29 = vpop.f32.mrf.mxu1  ;;  %v2481_v50 = vpop.f32.mrf.mxu0 }
 0x17f   : > { %v898_v31 = vpop.f32.mrf.mxu1  ;;  %v1040_v43 = vpop.f32.mrf.mxu0 }
 0x180   : > { %v921_v6 = vadd.f32 %v898_v31, %v3493_v33  ;;  %v1093_v34 = vadd.f32 %v1040_v43, %v3477_v61 }
 0x181   : > { %v2466_v48 = vpop.f32.mrf.mxu1  ;;  %v2484_v36 = vpop.f32.mrf.mxu0 }
 0x183   : > { %v901_v41 = vpop.f32.mrf.mxu1  ;;  %v1043_v58 = vpop.f32.mrf.mxu0 }
 0x184   : > { %v922_v52 = vadd.f32 %v901_v41, %v740_v40  ;;  %v1094_v53 = vadd.f32 %v1043_v58, %v3488_v56 }
 0x185   : > { %v2467_v39 = vpop.f32.mrf.mxu1  ;;  %v2485_v14 = vpop.f32.mrf.mxu0 }
 0x187   : > { %v1048_v22 = vpop.f32.mrf.mxu0  ;;  %v1198_v44 = vpop.f32.mrf.mxu1 }
 0x188   : > { %v1095_v17 = vadd.f32 %v1048_v22, %v3496_v35  ;;  %v1269_v16 = vadd.f32 %v1198_v44, %v1087_v51 }
 0x189   : > { %v2488_v62 = vpop.f32.mrf.mxu0  ;;  %v2510_v47 = vpop.f32.mrf.mxu1 }
 0x18b   : > { %v1051_v1 = vpop.f32.mrf.mxu0  ;;  %v1201_v33 = vpop.f32.mrf.mxu1 }
 0x18c   : > { %v1096_v61 = vadd.f32 %v1051_v1, %v3505_v42  ;;  %v1270_v54 = vadd.f32 %v1201_v33, %v1088_v11 }
 0x18d   : > { %v2489_v63 = vpop.f32.mrf.mxu0  ;;  %v2511_v55 = vpop.f32.mrf.mxu1 }
 0x18f   : > { %v1056_v24 = vpop.f32.mrf.mxu0  ;;  %v1206_v40 = vpop.f32.mrf.mxu1 }
 0x190   : > { %v1097_v56 = vadd.f32 %v1056_v24, %v3509_v46  ;;  %v1271_v8 = vadd.f32 %v1206_v40, %v1089_v30 }
 0x191   : > { %v2492_v59 = vpop.f32.mrf.mxu0  ;;  %v2514_v0 = vpop.f32.mrf.mxu1 }
 0x193   : > { %v1059_v15 = vpop.f32.mrf.mxu0  ;;  %v1209_v4 = vpop.f32.mrf.mxu1 }
 0x194   : > { %v1098_v35 = vadd.f32 %v1059_v15, %v3517_v28  ;;  %v1272_v51 = vadd.f32 %v1209_v4, %v1090_v49 }
 0x195   : > { %v2493_v37 = vpop.f32.mrf.mxu0  ;;  %v2515_v7 = vpop.f32.mrf.mxu1 }
 0x197   : > { %v1064_v18 = vpop.f32.mrf.mxu0  ;;  %v1214_v9 = vpop.f32.mrf.mxu1 }
 0x198   : > { %v1099_v42 = vadd.f32 %v1064_v18, %v3522_v5  ;;  %v1273_v11 = vadd.f32 %v1214_v9, %v1091_v32 }
 0x199   : > { %v2496_v12 = vpop.f32.mrf.mxu0  ;;  %v2518_v25 = vpop.f32.mrf.mxu1 }
 0x19b   : > { %v1067_v13 = vpop.f32.mrf.mxu0  ;;  %v1217_v19 = vpop.f32.mrf.mxu1 }
 0x19c   : > { %v1100_v46 = vadd.f32 %v1067_v13, %v918_v26  ;;  %v1274_v30 = vadd.f32 %v1217_v19, %v1092_v60 }
 0x19d   : > { %v2497_v20 = vpop.f32.mrf.mxu0  ;;  %v2519_v57 = vpop.f32.mrf.mxu1 }
 0x19f   : > { %v1072_v27 = vpop.f32.mrf.mxu0  ;;  %v1222_v21 = vpop.f32.mrf.mxu1 }
 0x1a0   : > { %v1101_v10 = vadd.f32 %v1072_v27, %v919_v38  ;;  %v1275_v28 = vadd.f32 %v1222_v21, %v1093_v34 }
 0x1a1   : > { %v2500_v49 = vpop.f32.mrf.mxu0  ;;  %v2522_v45 = vpop.f32.mrf.mxu1 }
 0x1a3   : > { %v1075_v23 = vpop.f32.mrf.mxu0  ;;  %v1225_v29 = vpop.f32.mrf.mxu1 }
 0x1a4   : > { %v1102_v50 = vadd.f32 %v1075_v23, %v920_v2  ;;  %v1276_v31 = vadd.f32 %v1225_v29, %v1094_v53 }
 0x1a5   : > { %v2501_v5 = vpop.f32.mrf.mxu0  ;;  %v2523_v32 = vpop.f32.mrf.mxu1 }
 0x1a7   : > { %v1080_v43 = vpop.f32.mrf.mxu0  ;;  %v1230_v48 = vpop.f32.mrf.mxu1 }
 0x1a8   : > { %v1103_v36 = vadd.f32 %v1080_v43, %v921_v6  ;;  %v1277_v41 = vadd.f32 %v1230_v48, %v1095_v17 }
 0x1a9   : > { %v2504_v26 = vpop.f32.mrf.mxu0  ;;  %v2526_v60 = vpop.f32.mrf.mxu1 }
 0x1ab   : > { %v1083_v58 = vpop.f32.mrf.mxu0  ;;  %v1233_v39 = vpop.f32.mrf.mxu1 }
 0x1ac   : > { %v1104_v14 = vadd.f32 %v1083_v58, %v922_v52  ;;  %v1278_v22 = vadd.f32 %v1233_v39, %v1096_v61  ;;  %v1860_v39 = vlaneseq }
 0x1ad   : > { %v2505_v38 = vpop.f32.mrf.mxu0  ;;  %v2527_v34 = vpop.f32.mrf.mxu1 }
 0x1af   : > { %v1238_v44 = vpop.f32.mrf.mxu1  ;;  %v1380_v62 = vpop.f32.mrf.mxu0 }
 0x1b0   : > { %v3544_v47 = vadd.f32 %v1238_v44, %v1097_v56  ;;  %v1451_v2 = vadd.f32 %v1380_v62, %v1269_v16  ;;  %v1861_v44 = vshrl.u32 %v1860_v39, 7 }
 0x1b1   : > { %v2530_v53 = vpop.f32.mrf.mxu1  ;;  %v2548_v1 = vpop.f32.mrf.mxu0 }
 0x1b2   : > { %v1866_v53 = vsub.s32 1, %v1861_v44 }
 0x1b3   : > { %v1241_v33 = vpop.f32.mrf.mxu1  ;;  %v1383_v63 = vpop.f32.mrf.mxu0 }
 0x1b4   : > { %v3546_v55 = vadd.f32 %v1241_v33, %v1098_v35  ;;  %v1452_v6 = vadd.f32 %v1383_v63, %v1270_v54 }
 0x1b5   : > { %v2531_v17 = vpop.f32.mrf.mxu1  ;;  %v2549_v24 = vpop.f32.mrf.mxu0 }
 0x1b7   : > { %v1246_v40 = vpop.f32.mrf.mxu1  ;;  %v1388_v59 = vpop.f32.mrf.mxu0 }
 0x1b8   : > { %v3548_v52 = vadd.f32 %v1246_v40, %v1099_v42  ;;  %v1453_v61 = vadd.f32 %v1388_v59, %v1271_v8 }
 0x1b9   : > { %v2534_v0 = vpop.f32.mrf.mxu1  ;;  %v2552_v15 = vpop.f32.mrf.mxu0 }
 0x1bb   : > { %v1249_v4 = vpop.f32.mrf.mxu1  ;;  %v1391_v56 = vpop.f32.mrf.mxu0 }
 0x1bc   : > { %v3550_v37 = vadd.f32 %v1249_v4, %v1100_v46  ;;  %v1454_v16 = vadd.f32 %v1391_v56, %v1272_v51 }
 0x1bd   : > { %v2535_v7 = vpop.f32.mrf.mxu1  ;;  %v2553_v18 = vpop.f32.mrf.mxu0 }
 0x1bf   : > { %v1254_v9 = vpop.f32.mrf.mxu1  ;;  %v1396_v35 = vpop.f32.mrf.mxu0 }
 0x1c0   : > { %v3552_v12 = vadd.f32 %v1254_v9, %v1101_v10  ;;  %v1455_v54 = vadd.f32 %v1396_v35, %v1273_v11 }
 0x1c1   : > { %v2538_v25 = vpop.f32.mrf.mxu1  ;;  %v2556_v13 = vpop.f32.mrf.mxu0 }
 0x1c3   : > { %v1257_v19 = vpop.f32.mrf.mxu1  ;;  %v1399_v42 = vpop.f32.mrf.mxu0 }
 0x1c4   : > { %v3554_v20 = vadd.f32 %v1257_v19, %v1102_v50  ;;  %v1456_v8 = vadd.f32 %v1399_v42, %v1274_v30 }
 0x1c5   : > { %v2539_v57 = vpop.f32.mrf.mxu1  ;;  %v2557_v27 = vpop.f32.mrf.mxu0 }
 0x1c7   : > { %v1262_v21 = vpop.f32.mrf.mxu1  ;;  %v1404_v46 = vpop.f32.mrf.mxu0 }
 0x1c8   : > { %v3556_v49 = vadd.f32 %v1262_v21, %v1103_v36  ;;  %v1457_v51 = vadd.f32 %v1404_v46, %v1275_v28 }
 0x1c9   : > { %v2542_v45 = vpop.f32.mrf.mxu1  ;;  %v2560_v23 = vpop.f32.mrf.mxu0 }
 0x1cb   : > { %v1265_v29 = vpop.f32.mrf.mxu1  ;;  %v1407_v10 = vpop.f32.mrf.mxu0 }
 0x1cc   : > { %v3558_v5 = vadd.f32 %v1265_v29, %v1104_v14  ;;  %v1458_v11 = vadd.f32 %v1407_v10, %v1276_v31 }
 0x1cd   : > { %v2543_v32 = vpop.f32.mrf.mxu1  ;;  %v2561_v43 = vpop.f32.mrf.mxu0 }
 0x1cf   : > { %v1412_v48 = vpop.f32.mrf.mxu0  ;;  %v1562_v50 = vpop.f32.mrf.mxu1 }
 0x1d0   : > { %v1459_v26 = vadd.f32 %v1412_v48, %v1277_v41  ;;  %v3560_v30 = vadd.f32 %v1562_v50, %v1451_v2  ;;  %v1858_v41 = vld [vmem:[%s3785_s3] sm:$0x3]  ;;  %v1862_v2 = vsub.s32 0, %v1861_v44 }
 0x1d1   : > { %v2564_v60 = vpop.f32.mrf.mxu0  ;;  %v2586_v58 = vpop.f32.mrf.mxu1  ;;  %v3568_v17 = vrot.slane %v1858_v41, %v1866_v53 }
 0x1d3   : > { %v1415_v36 = vpop.f32.mrf.mxu0  ;;  %v1565_v38 = vpop.f32.mrf.mxu1  ;;  %2220 = vmatprep.mubr.msk.f32.mxu1 %vm1869_vm4, %v3568_v17 }
 0x1d4   : > { %v1460_v28 = vadd.f32 %v1415_v36, %v1278_v22  ;;  %v3562_v34 = vadd.f32 %v1565_v38, %v1452_v6  ;;  %v3570_v6 = vrot.slane %v1858_v41, %v1862_v2 }
 0x1d5   : > { %v2565_v62 = vpop.f32.mrf.mxu0  ;;  %v2587_v14 = vpop.f32.mrf.mxu1 }
 0x1d7   : > { %v1420_v31 = vpop.f32.mrf.mxu0  ;;  %v1570_v1 = vpop.f32.mrf.mxu1 }
 0x1d8   : > { %v1461_v33 = vadd.f32 %v1420_v31, %v3544_v47  ;;  %v1635_v63 = vadd.f32 %v1570_v1, %v1453_v61 }
 0x1d9   : > { %v2568_v24 = vpop.f32.mrf.mxu0  ;;  %v2590_v22 = vpop.f32.mrf.mxu1 }
 0x1db   : > { %v1423_v40 = vpop.f32.mrf.mxu0  ;;  %v1573_v59 = vpop.f32.mrf.mxu1 }
 0x1dc   : > { %v3575_v0 = vadd.f32 %v1423_v40, %v3546_v55  ;;  %v1636_v15 = vadd.f32 %v1573_v59, %v1454_v16 }
 0x1dd   : > { %v2569_v4 = vpop.f32.mrf.mxu0  ;;  %v2591_v56 = vpop.f32.mrf.mxu1 }
 0x1df   : > { %v1428_v47 = vpop.f32.mrf.mxu0  ;;  %v1578_v61 = vpop.f32.mrf.mxu1 }
 0x1e0   : > { %v3578_v7 = vadd.f32 %v1428_v47, %v3548_v52  ;;  %v1637_v18 = vadd.f32 %v1578_v61, %v1455_v54 }
 0x1e1   : > { %v2572_v9 = vpop.f32.mrf.mxu0  ;;  %v2594_v35 = vpop.f32.mrf.mxu1 }
 0x1e3   : > { %v1431_v25 = vpop.f32.mrf.mxu0  ;;  %v1581_v13 = vpop.f32.mrf.mxu1 }
 0x1e4   : > { %v3581_v19 = vadd.f32 %v1431_v25, %v3550_v37  ;;  %v3583_v42 = vadd.f32 %v1581_v13, %v1456_v8 }
 0x1e5   : > { %v2573_v55 = vpop.f32.mrf.mxu0  ;;  %v2595_v57 = vpop.f32.mrf.mxu1 }
 0x1e7   : > { %v1436_v16 = vpop.f32.mrf.mxu0  ;;  %v1586_v27 = vpop.f32.mrf.mxu1 }
 0x1e8   : > { %v3586_v21 = vadd.f32 %v1436_v16, %v3552_v12  ;;  %v3588_v46 = vadd.f32 %v1586_v27, %v1457_v51 }
 0x1e9   : > { %v2576_v52 = vpop.f32.mrf.mxu0  ;;  %v2598_v54 = vpop.f32.mrf.mxu1 }
 0x1eb   : > { %v1439_v45 = vpop.f32.mrf.mxu0  ;;  %v1589_v23 = vpop.f32.mrf.mxu1 }
 0x1ec   : > { %v3591_v29 = vadd.f32 %v1439_v45, %v3554_v20  ;;  %v3593_v37 = vadd.f32 %v1589_v23, %v1458_v11 }
 0x1ed   : > { %v2577_v8 = vpop.f32.mrf.mxu0  ;;  %v2599_v10 = vpop.f32.mrf.mxu1 }
 0x1ef   : > { %v1444_v32 = vpop.f32.mrf.mxu0  ;;  %v1594_v43 = vpop.f32.mrf.mxu1 }
 0x1f0   : > { %v1467_v48 = vadd.f32 %v1444_v32, %v3556_v49  ;;  %v3596_v50 = vadd.f32 %v1594_v43, %v1459_v26 }
 0x1f1   : > { %v2580_v12 = vpop.f32.mrf.mxu0  ;;  %v2602_v51 = vpop.f32.mrf.mxu1 }
 0x1f3   : > { %v1447_v60 = vpop.f32.mrf.mxu0  ;;  %v1597_v58 = vpop.f32.mrf.mxu1 }
 0x1f4   : > { %v3599_v39 = vadd.f32 %v1447_v60, %v3558_v5  ;;  %v3601_v36 = vadd.f32 %v1597_v58, %v1460_v28 }
 0x1f5   : > { %v2581_v20 = vpop.f32.mrf.mxu0  ;;  %v2603_v11 = vpop.f32.mrf.mxu1 }
 0x1f7   : > { %v1602_v38 = vpop.f32.mrf.mxu1  ;;  %v1744_v44 = vpop.f32.mrf.mxu0 }
 0x1f8   : > { %v3603_v62 = vadd.f32 %v1602_v38, %v1461_v33  ;;  %v3606_v14 = vadd.f32 %v1744_v44, %v3560_v30 }
 0x1f9   : > { %v2606_v49 = vpop.f32.mrf.mxu1  ;;  %v2624_v26 = vpop.f32.mrf.mxu0 }
 0x1fb   : > { %v1605_v53 = vpop.f32.mrf.mxu1  ;;  %v1747_v31 = vpop.f32.mrf.mxu0 }
 0x1fc   : > { %v3609_v1 = vadd.f32 %v1747_v31, %v3562_v34 }
 0x1fd   : > { %v2607_v5 = vpop.f32.mrf.mxu1  ;;  %v2625_v41 = vpop.f32.mrf.mxu0 }
 0x1ff   : > { %v1610_v28 = vpop.f32.mrf.mxu1  ;;  %v1752_v2 = vpop.f32.mrf.mxu0 }
 0x200   : > { %v3611_v24 = vadd.f32 %v1752_v2, %v1635_v63 }
 0x201   : > { %v2610_v22 = vpop.f32.mrf.mxu1  ;;  %v2628_v40 = vpop.f32.mrf.mxu0 }
 0x202   : > { %v3629_v40 = vld [vmem:[%s3784_s2] ss:$0 sm:$0xff] }
 0x203   : > { %v1613_v33 = vpop.f32.mrf.mxu1  ;;  %v1755_v59 = vpop.f32.mrf.mxu0 }
 0x204   : > { %v3613_v4 = vadd.f32 %v1755_v59, %v1636_v15  ;;  %v1646_v41 = vadd.f32 %v1613_v33, %v3581_v19 }
 0x205   : > { %v2611_v30 = vpop.f32.mrf.mxu1  ;;  %v2629_v56 = vpop.f32.mrf.mxu0 }
 0x206   : > { %v1645_v30 = vadd.f32 %v1610_v28, %v3578_v7 }
 0x207   : > { %v1618_v47 = vpop.f32.mrf.mxu1  ;;  %v1760_v61 = vpop.f32.mrf.mxu0 }
 0x208   : > { %v3615_v9 = vadd.f32 %v1760_v61, %v1637_v18  ;;  %v1647_v26 = vadd.f32 %v1618_v47, %v3586_v21 }
 0x209   : > { %v2614_v34 = vpop.f32.mrf.mxu1  ;;  %v2632_v35 = vpop.f32.mrf.mxu0 }
 0x20b   : > { %v1621_v25 = vpop.f32.mrf.mxu1  ;;  %v3617_v13 = vpop.f32.mrf.mxu0 }
 0x20c   : > { %v1648_v31 = vadd.f32 %v1621_v25, %v3591_v29  ;;  %v1644_v29 = vadd.f32 %v1605_v53, %v3575_v0 }
 0x20d   : > { %v2615_v55 = vpop.f32.mrf.mxu1  ;;  %v2633_v63 = vpop.f32.mrf.mxu0 }
 0x20f   : > { %v1626_v57 = vpop.f32.mrf.mxu1  ;;  %v1768_v16 = vpop.f32.mrf.mxu0 }
 0x210   : > { %v3619_v27 = vadd.f32 %v1626_v57, %v1467_v48 }
 0x211   : > { %v2618_v52 = vpop.f32.mrf.mxu1  ;;  %v2636_v15 = vpop.f32.mrf.mxu0 }
 0x213   : > { %v3621_v54 = vpop.f32.mrf.mxu1  ;;  %v1771_v45 = vpop.f32.mrf.mxu0 }
 0x214   : > { %v1822_v57 = vadd.f32 %v1771_v45, %v3593_v37  ;;  %v1650_v45 = vadd.f32 %v3621_v54, %v3599_v39 }
 0x215   : > { %v2637_v23 = vpop.f32.mrf.mxu0  ;;  %v2619_v8 = vpop.f32.mrf.mxu1 }
 0x216   : > { %v1847_v23 = vadd.f32 %v3629_v40, %v1822_v57 }
 0x217   : > { %v1776_v18 = vpop.f32.mrf.mxu0 }
 0x218   : > { %v1823_v63 = vadd.f32 %v1776_v18, %v3596_v50  ;;  %v1820_v50 = vadd.f32 %v3617_v13, %v3583_v42  ;;  %v1843_v42 = vadd.f32 %v3629_v40, %v3613_v4  ;;  %v1842_v13 = vadd.f32 %v3629_v40, %v3611_v24 }
 0x219   : > { %v2640_v10 = vpop.f32.mrf.mxu0  ;;  %v1840_v4 = vadd.f32 %v3629_v40, %v3606_v14 }
 0x21a   : > { %v1848_v15 = vadd.f32 %v3629_v40, %v1823_v63 }
 0x21b   : > { %v1779_v32 = vpop.f32.mrf.mxu0 }
 0x21c   : > { %v1824_v25 = vadd.f32 %v1779_v32, %v3601_v36  ;;  %v1821_v36 = vadd.f32 %v1768_v16, %v3588_v46  ;;  %v1845_v46 = vadd.f32 %v3629_v40, %v1820_v50  ;;  %v1844_v16 = vadd.f32 %v3629_v40, %v3615_v9 }
 0x21d   : > { %v2641_v43 = vpop.f32.mrf.mxu0  ;;  %v1841_v9 = vadd.f32 %v3629_v40, %v3609_v1 }
 0x21e   : > { %v1849_v52 = vadd.f32 %v3629_v40, %v1824_v25  ;;  %v1846_v37 = vadd.f32 %v3629_v40, %v1821_v36  ;;  %v1950_v43 = vmul.f32 %v1848_v15, %v1848_v15 }
 0x21f   : > { %v1784_v12 = vpop.f32.mrf.mxu0 }
 0x220   : > { %v1825_v0 = vadd.f32 %v1784_v12, %v3603_v62  ;;  %v1949_v12 = vmul.f32 %v1847_v23, %v1847_v23 }
 0x221   : > { %v2644_v51 = vpop.f32.mrf.mxu0 }
 0x222   : > { %v1850_v62 = vadd.f32 %v3629_v40, %v1825_v0  ;;  %v1948_v51 = vmul.f32 %v1846_v37, %v1846_v37 }
 0x223   : > { %v1787_v60 = vpop.f32.mrf.mxu0 }
 0x224   : > { %v1826_v34 = vadd.f32 %v1787_v60, %v1644_v29  ;;  %v1952_v32 = vmul.f32 %v1850_v62, %v1850_v62  ;;  %v1947_v60 = vmul.f32 %v1845_v46, %v1845_v46 }
 0x225   : > { %v2645_v58 = vpop.f32.mrf.mxu0 }
 0x226   : > { %v1851_v55 = vadd.f32 %v3629_v40, %v1826_v34  ;;  %v1946_v58 = vmul.f32 %v1844_v16, %v1844_v16 }
 0x227   : > { %v1792_v20 = vpop.f32.mrf.mxu0 }
 0x228   : > { %v1827_v47 = vadd.f32 %v1792_v20, %v1645_v30  ;;  %v1953_v10 = vmul.f32 %v1851_v55, %v1851_v55  ;;  %v1945_v20 = vmul.f32 %v1843_v42, %v1843_v42 }
 0x229   : > { %v2648_v11 = vpop.f32.mrf.mxu0 }
 0x22a   : > { %v3648_v53 = vadd.f32 %v3629_v40, %v1827_v47  ;;  %v1944_v11 = vmul.f32 %v1842_v13, %v1842_v13 }
 0x22b   : > { %v1795_v38 = vpop.f32.mrf.mxu0 }
 0x22c   : > { %v1828_v56 = vadd.f32 %v1795_v38, %v1646_v41  ;;  %v1954_v54 = vmul.f32 %v3648_v53, %v3648_v53  ;;  %v1943_v38 = vmul.f32 %v1841_v9, %v1841_v9 }
 0x22d   : > { %v2649_v48 = vpop.f32.mrf.mxu0 }
 0x22e   : > { %v3642_v35 = vadd.f32 %v3629_v40, %v1828_v56  ;;  %v1942_v48 = vmul.f32 %v1840_v4, %v1840_v4 }
 0x22f   : > { %v1800_v44 = vpop.f32.mrf.mxu0 }
 0x230   : > { %v1829_v2 = vadd.f32 %v1800_v44, %v1647_v26  ;;  %v2030_v26 = vld [vmem:[%s2940_s29] sm:$0x1] }
 0x231   : > { %v2652_v49 = vpop.f32.mrf.mxu0 }
 0x232   : > { %v3637_v19 = vadd.f32 %v3629_v40, %v1829_v2  ;;  %v2034_v2 = vld [vmem:[%s2940_s29 + $0x1] sm:$0x1] }
 0x233   : > { %v1803_v5 = vpop.f32.mrf.mxu0 }
 0x234   : > { %v1830_v22 = vadd.f32 %v1803_v5, %v1648_v31  ;;  %v1956_v14 = vmul.f32 %v3637_v19, %v3637_v19 }
 0x235   : > { %v2653_v59 = vpop.f32.mrf.mxu0 }
 0x236   : > { %v3633_v61 = vadd.f32 %v3629_v40, %v1830_v22 }
 0x237   : > { %v1808_v21 = vpop.f32.mrf.mxu0 }
 0x238   : > { %1873 = vmatpush1.msra.mxu1 %v3633_v61  ;;  %v1831_v18 = vadd.f32 %v1808_v21, %v3619_v27  ;;  %v1957_v1 = vmul.f32 %v3633_v61, %v3633_v61  ;;  %v1955_v27 = vmul.f32 %v3642_v35, %v3642_v35 }
 0x239   : > { %v2656_v33 = vpop.f32.mrf.mxu0  ;;  %1874 = vmatprep.subr.mxu1 %v2831_v3 }
 0x23a   : > { %1875 = vmatpush1.msra.mxu1 %v3637_v19  ;;  %v1856_v24 = vadd.f32 %v3629_v40, %v1831_v18 }
 0x23b   : > { %v1811_v7 = vpop.f32.mrf.mxu0  ;;  %1876 = vmatprep.subr.mxu1 %v2831_v3 }
 0x23c   : > { %1877 = vmatpush1.msra.mxu1 %v3642_v35  ;;  %v1832_v8 = vadd.f32 %v1811_v7, %v1650_v45  ;;  %v1958_v49 = vmul.f32 %v1856_v24, %v1856_v24 }
 0x23d   : > { %1878 = vmatprep.subr.mxu1 %v2831_v3  ;;  %v2657_v28 = vpop.f32.mrf.mxu0 }
 0x23e   : > { %1879 = vmatpush1.msra.mxu1 %v3648_v53  ;;  %v1857_v39 = vadd.f32 %v3629_v40, %v1832_v8 }
 0x23f   : > { %1880 = vmatprep.subr.mxu1 %v2831_v3 }
 0x240   : > { %1881 = vmatpush1.msra.mxu1 %v1851_v55  ;;  %v1959_v44 = vmul.f32 %v1857_v39, %v1857_v39 }
 0x241   : > { %1882 = vmatprep.subr.mxu1 %v2831_v3 }
 0x242   : > { %1883 = vmatpush1.msra.mxu1 %v1850_v62 }
 0x243   : > { %1884 = vmatprep.subr.mxu1 %v2831_v3 }
 0x244   : > { %1885 = vmatpush1.msra.mxu1 %v1849_v52 }
 0x245   : > { %1886 = vmatprep.subr.mxu1 %v2831_v3 }
 0x246   : > { %1887 = vmatpush1.msra.mxu1 %v1848_v15 }
 0x247   : > { %1888 = vmatprep.subr.mxu1 %v2831_v3 }
 0x248   : > { %1889 = vmatpush1.msra.mxu1 %v1847_v23 }
 0x249   : > { %1890 = vmatprep.subr.mxu1 %v2831_v3 }
 0x24a   : > { %1891 = vmatpush1.msra.mxu1 %v1846_v37 }
 0x24b   : > { %1892 = vmatprep.subr.mxu1 %v2831_v3 }
 0x24c   : > { %1893 = vmatpush1.msra.mxu1 %v1845_v46 }
 0x24d   : > { %1894 = vmatprep.subr.mxu1 %v2831_v3 }
 0x24e   : > { %1895 = vmatpush1.msra.mxu1 %v1844_v16 }
 0x24f   : > { %1896 = vmatprep.subr.mxu1 %v2831_v3 }
 0x250   : > { %1897 = vmatpush1.msra.mxu1 %v1843_v42 }
 0x251   : > { %1898 = vmatprep.subr.mxu1 %v2831_v3 }
 0x252   : > { %1899 = vmatpush1.msra.mxu1 %v1842_v13 }
 0x253   : > { %1900 = vmatprep.subr.mxu1 %v2831_v3 }
 0x254   : > { %1901 = vmatpush1.msra.mxu1 %v1841_v9 }
 0x255   : > { %1902 = vmatprep.subr.mxu1 %v2831_v3 }
 0x256   : > { %1903 = vmatpush1.msra.mxu1 %v1840_v4 }
 0x257   : > { %1932 = vmatprep.subr.mxu1 %v2831_v3 }
 0x258   : > { %1933 = vmatpush2.msra.mxu1 %v1857_v39 }
 0x259   : > { %1934 = vmatprep.subr.mxu1 %v2831_v3 }
 0x25a   : > { %1935 = vmatpush2.msra.mxu1 %v1856_v24 }
 0x25b   : > { %1960 = vmatprep.subr.mxu1 %v2831_v3  ;;  %1937 = vmatmul.mubr.f32.vlgmr.msra.gmra.mxu1 %v3570_v6 }
 0x25c   : > { %1961 = vmatpush1.msra.mxu1 %v1957_v1  ;;  %2221 = vmatprep.mubr.msk.f32.mxu1 %vm1869_vm4, %v3568_v17  ;;  %v1951_v17 = vmul.f32 %v1849_v52, %v1849_v52 }
 0x25d   : > { %1962 = vmatprep.subr.mxu1 %v2831_v3 }
 0x25e   : > { %1963 = vmatpush1.msra.mxu1 %v1956_v14 }
 0x25f   : > { %1964 = vmatprep.subr.mxu1 %v2831_v3 }
 0x260   : > { %1965 = vmatpush1.msra.mxu1 %v1955_v27 }
 0x261   : > { %1966 = vmatprep.subr.mxu1 %v2831_v3 }
 0x262   : > { %1967 = vmatpush1.msra.mxu1 %v1954_v54 }
 0x263   : > { %1968 = vmatprep.subr.mxu1 %v2831_v3 }
 0x264   : > { %1969 = vmatpush1.msra.mxu1 %v1953_v10 }
 0x265   : > { %1970 = vmatprep.subr.mxu1 %v2831_v3 }
 0x266   : > { %1971 = vmatpush1.msra.mxu1 %v1952_v32 }
 0x267   : > { %1972 = vmatprep.subr.mxu1 %v2831_v3 }
 0x268   : > { %1973 = vmatpush1.msra.mxu1 %v1951_v17 }
 0x269   : > { %1974 = vmatprep.subr.mxu1 %v2831_v3 }
 0x26a   : > { %1975 = vmatpush1.msra.mxu1 %v1950_v43 }
 0x26b   : > { %1976 = vmatprep.subr.mxu1 %v2831_v3 }
 0x26c   : > { %1977 = vmatpush1.msra.mxu1 %v1949_v12 }
 0x26d   : > { %1978 = vmatprep.subr.mxu1 %v2831_v3 }
 0x26e   : > { %1979 = vmatpush1.msra.mxu1 %v1948_v51 }
 0x26f   : > { %1980 = vmatprep.subr.mxu1 %v2831_v3 }
 0x270   : > { %1981 = vmatpush1.msra.mxu1 %v1947_v60 }
 0x271   : > { %1982 = vmatprep.subr.mxu1 %v2831_v3 }
 0x272   : > { %1983 = vmatpush1.msra.mxu1 %v1946_v58 }
 0x273   : > { %1984 = vmatprep.subr.mxu1 %v2831_v3 }
 0x274   : > { %1985 = vmatpush1.msra.mxu1 %v1945_v20 }
 0x275   : > { %1986 = vmatprep.subr.mxu1 %v2831_v3 }
 0x276   : > { %1987 = vmatpush1.msra.mxu1 %v1944_v11 }
 0x277   : > { %1988 = vmatprep.subr.mxu1 %v2831_v3 }
 0x278   : > { %1989 = vmatpush1.msra.mxu1 %v1943_v38 }
 0x279   : > { %1990 = vmatprep.subr.mxu1 %v2831_v3 }
 0x27a   : > { %1991 = vmatpush1.msra.mxu1 %v1942_v48 }
 0x27b   : > { %2020 = vmatprep.subr.mxu1 %v2831_v3 }
 0x27c   : > { %2021 = vmatpush2.msra.mxu1 %v1959_v44 }
 0x27d   : > { %2022 = vmatprep.subr.mxu1 %v2831_v3 }
 0x27e   : > { %2023 = vmatpush2.msra.mxu1 %v1958_v49 }
 0x27f   : > { %2025 = vmatmul.mubr.f32.vlgmr.msra.gmra.mxu1 %v3570_v6 }
 0x31b   : > { %v1938_v31 = vpop.f32.mrf.mxu1 }
 0x31c   : > { %v2031_v5 = vadd.f32 %v2030_v26, %v1938_v31 }
 0x31d   : > { %v1940_v41 = vpop.f32.mrf.mxu1 }
 0x31e   : > { %2033 = vst.msk [vmem:[%s2940_s29] sm:$0x1] %vm2032_vm5, %v2031_v5 }
 0x33f   : > { %v2026_v22 = vpop.f32.mrf.mxu1 }
 0x340   : > { %v2035_v40 = vadd.f32 %v2034_v2, %v2026_v22 }
 0x341   : > { %v2028_v3 = vpop.f32.mrf.mxu1 }
 0x342   : > { %2036 = vst.msk [vmem:[%s2940_s29 + $0x1] sm:$0x1] %vm2032_vm5, %v2035_v40 }
 0x343   : > { %2749 = shalt.err (!%p2746_p8)
}
 0x344   : > { %s2750_s29 = scalar_lea.hbm %s3733_s7, 32  ;;  %s2754_s13 = scalar_lea.hbm %s3786_s4, 64 }
 0x345   : > { %p2751_p10 = scmp.ne.s32.totalorder %s3733_s7, %s2750_s29  ;;  %p2755_p13 = scmp.lt.s32.totalorder %s3733_s7, %s3786_s4 }
 0x346   : > { %p2756_p0 = scmp.lt.s32.totalorder %s2754_s13, %s2750_s29 }
 0x347   : > { %p2752_p11 = pnand %p2751_p10, %p2908_p3 }
 0x348   : > { %p2757_p1 = por %p2756_p0, %p2755_p13 }
 0x349   : > { %p2753_p12 = pneg %p2752_p11 }
 0x34b   : > { %p2758_p2 = pnand %p2757_p1, %p2753_p12 }
 0x34d   : > { %2761 = shalt.err (!%p2758_p2)
}
 0x34e   : > { %2662 = dma.vmem_to_hbm [thread:$0]  (%p2908_p3), %s2052_s30, 32, %s3733_s7, %s2038_s9  }
 0x34f PF: > { %p2668_p4 = scmp.ge.s32.totalorder %s2828_s22, 2  ;;  %s2063_s8 = sand.u32 1, %s2800_s15  }
 0x350   : > { %s2064_s18 = scalar_lea.sflag [#allocation3], %s2063_s8 }
 0x351   : > { %p2665_p5 = pnand %p2668_p4, %p2918_p9 }
 0x353   : > { %p2666_p6 = pneg %p2665_p5 }
 0x355   : > { %2795 = dma.done.wait (%p2666_p6), %s2064_s18, 32  }
 0x356   : > { %2797 = vsyncadd (%p2666_p6), %s2064_s18, 4294967264  ;;  %s17_s22 = sadd.s32 1, %s2828_s22   ;;  %s3789_s15 = smov %s2804_s16 }
 0x357   : > { %p14_p7 = scmp.ge.s32.totalorder %s17_s22, 6   ;;  %s3790_s16 = smov %s2808_s17 }
 0x358   : > { %s3791_s17 = smov %s2926_s5  ;;  %s3792_s18 = smov %s2820_s20 }
 0x359   : > { %s3793_s19 = smov %s2824_s21  ;;  %s3794_s20 = smov %s3797_s25 }
 0x35a   : > { %s3795_s21 = smov %s3801_s26  ;;  %16 = sbr.rel (!%p14_p7) target bundleno = 5 (0x5), region = 75 }
 0x35f   :  { %2069 = vsyncpa [#allocation3], 1 }
 0x360   :  { %2071 = vsyncpa [#allocation3 + $0x1], 1 }

</bundles_post_ra>
